<compile_context>
chip_gen: v7x
topology: tpu7x:2x2x1
jax: 0.10.0
libtpu: 0.0.40
codegen_flags: <defaults>
</compile_context>

<pallas_src>
import functools
import numpy as np
import jax
import jax.numpy as jnp
from jax import lax
from jax.experimental import pallas as pl
from jax.experimental.pallas import tpu as pltpu

NEG_SLOPE = 0.01          # nn.LeakyReLU() default
TAIL = 8                  # zero rows appended to every row buffer (strided-read slack)
# Per-image padded-row layout: layer l's input has PAD_l zero rows on top.  With
# PAD = (7, 3, 1) every conv tap kh reads flat row (2*r + kh) of its input buffer,
# where r is the output pseudo-row index -- a single stride-2 read per tap.
PAD1, PAD2, PAD3 = 7, 3, 1


def _round_up(x, m):
    return ((x + m - 1) // m) * m


# ----------------------------- fused kernel -----------------------------

def _classifier_kernel(x_ref, m1_ref, b1_ref, msk1_ref,
                       m2_ref, b2_ref, msk2_ref,
                       m3_ref, b3_ref, gfc_ref, bfc_ref,
                       out_ref, s2_ref, s3_ref, s4_ref, *, dims):
    nb, r_out1, r_out2, r_out3, f_size = dims
    f32, bf16 = jnp.float32, jnp.bfloat16

    def lrelu(y):
        return jnp.where(y >= 0.0, y, NEG_SLOPE * y)

    def conv_bn_lrelu(src_ref, m_ref, b_ref, n_rows):
        # k=4, s=2, p=1 conv with width/channel folded into the weight:
        # one small matmul per kernel row kh, gathered with a stride-2 row read.
        acc = jnp.dot(src_ref[pl.ds(0, n_rows, stride=2), :].astype(bf16),
                      m_ref[0], preferred_element_type=f32)
        for kh in range(1, 4):
            g = src_ref[pl.ds(kh, n_rows, stride=2), :].astype(bf16)
            acc = acc + jnp.dot(g, m_ref[kh], preferred_element_type=f32)
        return lrelu(acc + b_ref[...])           # BN scale folded into m, shift in b

    def store_padded(dst_ref, val, n_rows):
        dst_ref[pl.ds(0, n_rows), :] = val
        tail = dst_ref.shape[0] - n_rows
        dst_ref[pl.ds(n_rows, tail), :] = jnp.zeros((tail, dst_ref.shape[1]), f32)

    # ---- conv1 + BN + LeakyReLU (streams the pre-padded x tile, true lane width) ----
    a1 = conv_bn_lrelu(x_ref, m1_ref, b1_ref, nb * r_out1)
    a1 = jnp.where(msk1_ref[...] > 0.5, a1, 0.0)     # zero rows = conv2's padding
    store_padded(s2_ref, a1, nb * r_out1)

    # ---- conv2 ----
    a2 = conv_bn_lrelu(s2_ref, m2_ref, b2_ref, nb * r_out2)
    a2 = jnp.where(msk2_ref[...] > 0.5, a2, 0.0)
    store_padded(s3_ref, a2, nb * r_out2)

    # ---- conv3 (garbage pseudo-rows are never read back, so no mask needed) ----
    s4_ref[...] = conv_bn_lrelu(s3_ref, m3_ref, b3_ref, nb * r_out3)

    # ---- Linear; torch NCHW .view(-1, f_dim) folded into per-spatial-row weights.
    # Image j's spatial row `oh` is a stride-r_out3 row read -- no gather matmul. ----
    logits = jnp.zeros((nb, out_ref.shape[1]), f32)
    for oh in range(f_size):
        g = s4_ref[pl.ds(oh, nb, stride=r_out3), :].astype(bf16)
        logits = logits + jnp.dot(g, gfc_ref[oh], preferred_element_type=f32)
    out_ref[...] = logits + bfc_ref[...]


# ------------------------ host-side operand prep ------------------------

def _fold_bn(bias, gamma, beta, mean, var, eps=1e-5):
    scale = gamma / jnp.sqrt(var + eps)
    shift = (bias - mean) * scale + beta          # conv bias folded into BN shift
    return scale, shift


def _folded_conv_weight(w, bn_scale, w_in):
    """(Cout, Cin, 4, 4) torch conv weight -> (4, W_in*Cin, W_out*Cout) per-kernel-row
    matrices with the kw taps, the stride-2/pad-1 column geometry and the BatchNorm
    scale folded in."""
    cout, cin = w.shape[0], w.shape[1]
    w_out = w_in // 2
    sel = np.zeros((4, w_in, w_out), np.float32)          # shape-only constant
    for kw in range(4):
        for ow in range(w_out):
            iw = 2 * ow + kw - 1
            if 0 <= iw < w_in:
                sel[kw, iw, ow] = 1.0
    wb = jnp.transpose(w, (2, 3, 1, 0)) * bn_scale[None, None, None, :]  # (kh,kw,ci,co)
    m = jnp.einsum('wio,hwcd->hicod', jnp.asarray(sel), wb)
    return m.reshape(4, w_in * cin, w_out * cout).astype(jnp.bfloat16)


def _bias_row(shift, w_out):
    # lane = ow*Cout + co  ->  bias[lane] = shift[co]
    return jnp.tile(shift.astype(jnp.float32), (w_out,)).reshape(1, -1)


def _row_mask(nb, rout, pad, h):
    m = np.zeros((nb * rout, 1), np.float32)
    for n in range(nb):
        m[n * rout + pad: n * rout + pad + h, 0] = 1.0
    return jnp.asarray(m)


# ------------------------------ forward ------------------------------

@jax.jit
def classifier_forward(x_nchw, params):
    cw1, cb1, g1, be1, rm1, rv1 = params["conv1"]
    cw2, cb2, g2, be2, rm2, rv2 = params["conv2"]
    cw3, cb3, g3, be3, rm3, rv3 = params["conv3"]
    fc_w, fc_b = params["fc_w"], params["fc_b"]

    N, c_in, H, W = x_nchw.shape
    c1, c2, c3 = cw1.shape[0], cw2.shape[0], cw3.shape[0]
    ncls = fc_w.shape[0]
    assert H == W and H % 8 == 0
    H1, H2, H3 = H // 2, H // 4, H // 8          # spatial size after conv1/2/3
    f_size = H3
    assert fc_w.shape[1] == c3 * f_size * f_size
    # every folded (width*channel) lane group must fit one 128-lane register
    assert W * c_in <= 128 and H1 * c1 <= 128 and H2 * c2 <= 128 and H3 * c3 <= 128, \
        "im_size * k_num too large for the single-lane-group folded layout"
    # TODO(synk): im_size*k_num > 1024 needs the folded width axis split over several
    # 128-lane groups; BatchNorm uses inference (running-stats) semantics only.

    # per-image padded row counts; each layer's input rows = 2 * its output pseudo-rows
    r_out3 = H3 + 2
    r_out2, r_out1 = 2 * r_out3, 4 * r_out3
    r_in3, r_in2, r_in1 = 2 * r_out3, 2 * r_out2, 2 * r_out1
    assert r_in1 >= H + PAD1 + 1 and r_in2 >= H1 + PAD2 + 1 and r_in3 >= H2 + PAD3 + 1

    # images per grid step: bigger NB amortizes per-step overhead on v5e/v6e;
    # on v7x the grid only uses both TensorCores when N >= 2*NB.
    NB = 32 if N >= 64 else 8
    n_pad = _round_up(N, NB)
    steps = n_pad // NB
    L1 = W * c_in

    # input tile: rows = (image, padded h), lanes = (w, c_in); the zero rows provide
    # the conv "padding=1" plus the strided-read slack, baked into every grid block.
    x = jnp.transpose(x_nchw, (0, 2, 3, 1)).astype(jnp.float32).reshape(N, H, L1)
    x = jnp.pad(x, ((0, n_pad - N), (PAD1, r_in1 - PAD1 - H), (0, 0)))
    x = x.reshape(steps, NB * r_in1, L1)
    x = jnp.pad(x, ((0, 0), (0, TAIL), (0, 0))).reshape(steps * (NB * r_in1 + TAIL), L1)

    sc1, sh1 = _fold_bn(cb1, g1, be1, rm1, rv1)
    sc2, sh2 = _fold_bn(cb2, g2, be2, rm2, rv2)
    sc3, sh3 = _fold_bn(cb3, g3, be3, rm3, rv3)

    m1 = _folded_conv_weight(cw1, sc1, W)
    m2 = _folded_conv_weight(cw2, sc2, H1)
    m3 = _folded_conv_weight(cw3, sc3, H2)
    b1, b2, b3 = _bias_row(sh1, H1), _bias_row(sh2, H2), _bias_row(sh3, H3)

    gfc = jnp.transpose(fc_w.reshape(ncls, c3, f_size, f_size), (2, 3, 1, 0))
    gfc = gfc.reshape(f_size, f_size * c3, ncls).astype(jnp.bfloat16)
    bfc = fc_b.astype(jnp.float32).reshape(1, -1)

    msk1 = _row_mask(NB, r_out1, PAD2, H1)
    msk2 = _row_mask(NB, r_out2, PAD3, H2)

    operands = (x, m1, b1, msk1, m2, b2, msk2, m3, b3, gfc, bfc)

    def _const_spec(a):
        return pl.BlockSpec(a.shape, lambda i, _nd=a.ndim: (0,) * _nd)

    in_specs = [pl.BlockSpec((NB * r_in1 + TAIL, L1), lambda i: (i, 0))]
    in_specs += [_const_spec(a) for a in operands[1:]]

    kernel = functools.partial(
        _classifier_kernel, dims=(NB, r_out1, r_out2, r_out3, f_size))

    flops = 2 * steps * 4 * (NB * r_out1 * L1 * (H1 * c1)
                             + NB * r_out2 * (H1 * c1) * (H2 * c2)
                             + NB * r_out3 * (H2 * c2) * (H3 * c3)) \
        + 2 * steps * f_size * NB * (H3 * c3) * ncls
    bytes_accessed = int(x.size * 4 + n_pad * ncls * 4
                         + sum(a.size * a.dtype.itemsize for a in operands[1:]))

    out = pl.pallas_call(
        kernel,
        out_shape=jax.ShapeDtypeStruct((n_pad, ncls), jnp.float32),
        grid=(steps,),
        in_specs=in_specs,
        out_specs=pl.BlockSpec((NB, ncls), lambda i: (i, 0)),
        scratch_shapes=[
            pltpu.VMEM((NB * r_in2 + TAIL, H1 * c1), jnp.float32),   # conv2 input
            pltpu.VMEM((NB * r_in3 + TAIL, H2 * c2), jnp.float32),   # conv3 input
            pltpu.VMEM((NB * r_out3, H3 * c3), jnp.float32),         # FC input
        ],
        compiler_params=pltpu.CompilerParams(
            dimension_semantics=("parallel",)),     # shards steps across v7x's 2 TCs
        cost_estimate=pl.CostEstimate(
            flops=int(flops), transcendentals=0, bytes_accessed=bytes_accessed),
    )(*operands)

    return out[:N]


def classifier_predict(x_nchw, params):
    return jnp.argmax(classifier_forward(x_nchw, params), axis=1)


# --------------------------- params / reference ---------------------------

def init_params(key, c_in=1, k_num=16, class_num=10, im_size=16):
    ks = jax.random.split(key, 14)

    def conv_block(k0, k1, k2, k3, cin, cout):
        w = 0.05 * jax.random.normal(k0, (cout, cin, 4, 4), jnp.float32)
        b = 0.05 * jax.random.normal(k1, (cout,), jnp.float32)
        gamma = 1.0 + 0.1 * jax.random.normal(k2, (cout,), jnp.float32)
        beta = 0.1 * jax.random.normal(k3, (cout,), jnp.float32)
        run_mean = jnp.zeros((cout,), jnp.float32)     # PyTorch default running stats
        run_var = jnp.ones((cout,), jnp.float32)
        return (w, b, gamma, beta, run_mean, run_var)

    f_size = im_size // 8
    f_dim = k_num * f_size ** 2
    return {
        "conv1": conv_block(ks[0], ks[1], ks[2], ks[3], c_in, k_num // 4),
        "conv2": conv_block(ks[4], ks[5], ks[6], ks[7], k_num // 4, k_num // 2),
        "conv3": conv_block(ks[8], ks[9], ks[10], ks[11], k_num // 2, k_num),
        "fc_w": 0.05 * jax.random.normal(ks[12], (class_num, f_dim), jnp.float32),
        "fc_b": 0.05 * jax.random.normal(ks[13], (class_num,), jnp.float32),
    }


def reference_forward(x, params):
    """Pure-JAX reference (f32) mirroring the PyTorch module in eval mode."""
    def conv_block(x, w, b, g, beta, mean, var, eps=1e-5):
        y = lax.conv_general_dilated(x, w, (2, 2), ((1, 1), (1, 1)),
                                     dimension_numbers=("NCHW", "OIHW", "NCHW"))
        y = y + b[None, :, None, None]
        y = (y - mean[None, :, None, None]) / jnp.sqrt(var[None, :, None, None] + eps)
        y = y * g[None, :, None, None] + beta[None, :, None, None]
        return jnp.where(y >= 0, y, NEG_SLOPE * y)

    x = conv_block(x, *params["conv1"])
    x = conv_block(x, *params["conv2"])
    x = conv_block(x, *params["conv3"])
    x = x.reshape(x.shape[0], -1)
    return x @ params["fc_w"].T + params["fc_b"]


if __name__ == "__main__":
    key = jax.random.PRNGKey(0)
    k_x, k_p = jax.random.split(key)

    B, C_IN, IM, K_NUM, NCLS = 2, 1, 16, 16, 10
    x = jax.random.normal(k_x, (B, C_IN, IM, IM), jnp.float32)
    params = init_params(k_p, c_in=C_IN, k_num=K_NUM, class_num=NCLS, im_size=IM)

    logits = classifier_forward(x, params)
    preds = classifier_predict(x, params)
    jax.block_until_ready((logits, preds))

    assert logits.shape == (B, NCLS), logits.shape
    assert preds.shape == (B,), preds.shape

    ref = reference_forward(x, params)
    np.testing.assert_allclose(np.asarray(logits), np.asarray(ref), rtol=5e-2, atol=2e-2)

    print("KERNEL_OK")
</pallas_src>

<mosaic_0001>
module attributes {stable_mosaic.version = 11 : i64} {
  func.func @_classifier_kernel(%arg0: i32, %arg1: memref<264x16xf32, #tpu.memory_space<vmem>>, %arg2: memref<4x16x32xbf16, #tpu.memory_space<vmem>>, %arg3: memref<1x32xf32, #tpu.memory_space<vmem>>, %arg4: memref<128x1xf32, #tpu.memory_space<vmem>>, %arg5: memref<4x32x32xbf16, #tpu.memory_space<vmem>>, %arg6: memref<1x32xf32, #tpu.memory_space<vmem>>, %arg7: memref<64x1xf32, #tpu.memory_space<vmem>>, %arg8: memref<4x32x32xbf16, #tpu.memory_space<vmem>>, %arg9: memref<1x32xf32, #tpu.memory_space<vmem>>, %arg10: memref<2x32x10xbf16, #tpu.memory_space<vmem>>, %arg11: memref<1x10xf32, #tpu.memory_space<vmem>>, %arg12: memref<8x10xf32, #tpu.memory_space<vmem>>, %arg13: memref<136x32xf32, #tpu.memory_space<vmem>>, %arg14: memref<72x32xf32, #tpu.memory_space<vmem>>, %arg15: memref<32x32xf32, #tpu.memory_space<vmem>>) attributes {dimension_semantics = [#tpu.dimension_semantics<parallel>], iteration_bounds = array<i64: 1>, scalar_prefetch = 0 : i64, scratch_operands = 3 : i64, tpu.core_type = #tpu.core_type<tc>, window_params = [{transform_indices = @transform_0, window_bounds = array<i64: 264, 16>}, {pipeline_mode = #tpu.pipeline_mode<synchronous>, transform_indices = @transform_1, window_bounds = array<i64: 4, 16, 32>}, {pipeline_mode = #tpu.pipeline_mode<synchronous>, transform_indices = @transform_2, window_bounds = array<i64: 1, 32>}, {pipeline_mode = #tpu.pipeline_mode<synchronous>, transform_indices = @transform_3, window_bounds = array<i64: 128, 1>}, {pipeline_mode = #tpu.pipeline_mode<synchronous>, transform_indices = @transform_4, window_bounds = array<i64: 4, 32, 32>}, {pipeline_mode = #tpu.pipeline_mode<synchronous>, transform_indices = @transform_5, window_bounds = array<i64: 1, 32>}, {pipeline_mode = #tpu.pipeline_mode<synchronous>, transform_indices = @transform_6, window_bounds = array<i64: 64, 1>}, {pipeline_mode = #tpu.pipeline_mode<synchronous>, transform_indices = @transform_7, window_bounds = array<i64: 4, 32, 32>}, {pipeline_mode = #tpu.pipeline_mode<synchronous>, transform_indices = @transform_8, window_bounds = array<i64: 1, 32>}, {pipeline_mode = #tpu.pipeline_mode<synchronous>, transform_indices = @transform_9, window_bounds = array<i64: 2, 32, 10>}, {pipeline_mode = #tpu.pipeline_mode<synchronous>, transform_indices = @transform_10, window_bounds = array<i64: 1, 10>}, {transform_indices = @transform_11, window_bounds = array<i64: 8, 10>}]} {
    %c0 = arith.constant 0 : index
    %c0_0 = arith.constant 0 : index
    %0 = tpu.strided_load %arg1[%c0, %c0_0] {strides = array<i32: 2, 1>} : memref<264x16xf32, #tpu.memory_space<vmem>>, vector<128x16xf32>
    %1 = arith.truncf %0 : vector<128x16xf32> to vector<128x16xbf16>
    %c0_1 = arith.constant 0 : index
    %c0_2 = arith.constant 0 : index
    %c0_3 = arith.constant 0 : index
    %2 = vector.load %arg2[%c0_1, %c0_2, %c0_3] : memref<4x16x32xbf16, #tpu.memory_space<vmem>>, vector<1x16x32xbf16>
    %3 = vector.shape_cast %2 : vector<1x16x32xbf16> to vector<16x32xbf16>
    %cst = arith.constant dense<0.000000e+00> : vector<128x32xf32>
    %4 = tpu.matmul %1, %3, %cst {dimension_numbers = #tpu.dot_dimension_numbers<[1], [0], [0], [1], [0, 0, 1, 1], [], []>} : vector<128x16xbf16>, vector<16x32xbf16>, vector<128x32xf32> -> vector<128x32xf32>
    %c1 = arith.constant 1 : index
    %c0_4 = arith.constant 0 : index
    %5 = tpu.strided_load %arg1[%c1, %c0_4] {strides = array<i32: 2, 1>} : memref<264x16xf32, #tpu.memory_space<vmem>>, vector<128x16xf32>
    %6 = arith.truncf %5 : vector<128x16xf32> to vector<128x16xbf16>
    %c1_5 = arith.constant 1 : index
    %c0_6 = arith.constant 0 : index
    %c0_7 = arith.constant 0 : index
    %7 = vector.load %arg2[%c1_5, %c0_6, %c0_7] : memref<4x16x32xbf16, #tpu.memory_space<vmem>>, vector<1x16x32xbf16>
    %8 = vector.shape_cast %7 : vector<1x16x32xbf16> to vector<16x32xbf16>
    %cst_8 = arith.constant dense<0.000000e+00> : vector<128x32xf32>
    %9 = tpu.matmul %6, %8, %cst_8 {dimension_numbers = #tpu.dot_dimension_numbers<[1], [0], [0], [1], [0, 0, 1, 1], [], []>} : vector<128x16xbf16>, vector<16x32xbf16>, vector<128x32xf32> -> vector<128x32xf32>
    %10 = arith.addf %4, %9 : vector<128x32xf32>
    %c2 = arith.constant 2 : index
    %c0_9 = arith.constant 0 : index
    %11 = tpu.strided_load %arg1[%c2, %c0_9] {strides = array<i32: 2, 1>} : memref<264x16xf32, #tpu.memory_space<vmem>>, vector<128x16xf32>
    %12 = arith.truncf %11 : vector<128x16xf32> to vector<128x16xbf16>
    %c2_10 = arith.constant 2 : index
    %c0_11 = arith.constant 0 : index
    %c0_12 = arith.constant 0 : index
    %13 = vector.load %arg2[%c2_10, %c0_11, %c0_12] : memref<4x16x32xbf16, #tpu.memory_space<vmem>>, vector<1x16x32xbf16>
    %14 = vector.shape_cast %13 : vector<1x16x32xbf16> to vector<16x32xbf16>
    %cst_13 = arith.constant dense<0.000000e+00> : vector<128x32xf32>
    %15 = tpu.matmul %12, %14, %cst_13 {dimension_numbers = #tpu.dot_dimension_numbers<[1], [0], [0], [1], [0, 0, 1, 1], [], []>} : vector<128x16xbf16>, vector<16x32xbf16>, vector<128x32xf32> -> vector<128x32xf32>
    %16 = arith.addf %10, %15 : vector<128x32xf32>
    %c3 = arith.constant 3 : index
    %c0_14 = arith.constant 0 : index
    %17 = tpu.strided_load %arg1[%c3, %c0_14] {strides = array<i32: 2, 1>} : memref<264x16xf32, #tpu.memory_space<vmem>>, vector<128x16xf32>
    %18 = arith.truncf %17 : vector<128x16xf32> to vector<128x16xbf16>
    %c3_15 = arith.constant 3 : index
    %c0_16 = arith.constant 0 : index
    %c0_17 = arith.constant 0 : index
    %19 = vector.load %arg2[%c3_15, %c0_16, %c0_17] : memref<4x16x32xbf16, #tpu.memory_space<vmem>>, vector<1x16x32xbf16>
    %20 = vector.shape_cast %19 : vector<1x16x32xbf16> to vector<16x32xbf16>
    %cst_18 = arith.constant dense<0.000000e+00> : vector<128x32xf32>
    %21 = tpu.matmul %18, %20, %cst_18 {dimension_numbers = #tpu.dot_dimension_numbers<[1], [0], [0], [1], [0, 0, 1, 1], [], []>} : vector<128x16xbf16>, vector<16x32xbf16>, vector<128x32xf32> -> vector<128x32xf32>
    %22 = arith.addf %16, %21 : vector<128x32xf32>
    %c0_19 = arith.constant 0 : index
    %c0_20 = arith.constant 0 : index
    %23 = vector.load %arg3[%c0_19, %c0_20] : memref<1x32xf32, #tpu.memory_space<vmem>>, vector<1x32xf32>
    %24 = vector.broadcast %23 : vector<1x32xf32> to vector<128x32xf32>
    %25 = arith.addf %22, %24 : vector<128x32xf32>
    %cst_21 = arith.constant 0.000000e+00 : f32
    %26 = vector.broadcast %cst_21 : f32 to vector<128x32xf32>
    %27 = arith.cmpf oge, %25, %26 : vector<128x32xf32>
    %cst_22 = arith.constant 0.00999999977 : f32
    %28 = vector.broadcast %cst_22 : f32 to vector<128x32xf32>
    %29 = arith.mulf %28, %25 : vector<128x32xf32>
    %30 = arith.select %27, %25, %29 : vector<128x32xi1>, vector<128x32xf32>
    %c0_23 = arith.constant 0 : index
    %c0_24 = arith.constant 0 : index
    %31 = vector.load %arg4[%c0_23, %c0_24] : memref<128x1xf32, #tpu.memory_space<vmem>>, vector<128x1xf32>
    %cst_25 = arith.constant 5.000000e-01 : f32
    %32 = vector.broadcast %cst_25 : f32 to vector<128x1xf32>
    %33 = arith.cmpf ogt, %31, %32 : vector<128x1xf32>
    %cst_26 = arith.constant 0.000000e+00 : f32
    %34 = vector.shape_cast %33 : vector<128x1xi1> to vector<128x1xi1>
    %35 = vector.broadcast %34 : vector<128x1xi1> to vector<128x32xi1>
    %36 = vector.broadcast %cst_26 : f32 to vector<128x32xf32>
    %37 = arith.select %35, %30, %36 : vector<128x32xi1>, vector<128x32xf32>
    %c0_27 = arith.constant 0 : index
    %c0_28 = arith.constant 0 : index
    %38 = vector.load %arg13[%c0_27, %c0_28] : memref<136x32xf32, #tpu.memory_space<vmem>>, vector<128x32xf32>
    tpu.vector_store %arg13[%c0_27, %c0_28], %37 {strides = array<i32>} : memref<136x32xf32, #tpu.memory_space<vmem>>, vector<128x32xf32>,
    %cst_29 = arith.constant 0.000000e+00 : f32
    %39 = vector.broadcast %cst_29 : f32 to vector<8x32xf32>
    %c128 = arith.constant 128 : index
    %c0_30 = arith.constant 0 : index
    %40 = vector.load %arg13[%c128, %c0_30] : memref<136x32xf32, #tpu.memory_space<vmem>>, vector<8x32xf32>
    tpu.vector_store %arg13[%c128, %c0_30], %39 {strides = array<i32>} : memref<136x32xf32, #tpu.memory_space<vmem>>, vector<8x32xf32>,
    %c0_31 = arith.constant 0 : index
    %c0_32 = arith.constant 0 : index
    %41 = tpu.strided_load %arg13[%c0_31, %c0_32] {strides = array<i32: 2, 1>} : memref<136x32xf32, #tpu.memory_space<vmem>>, vector<64x32xf32>
    %42 = arith.truncf %41 : vector<64x32xf32> to vector<64x32xbf16>
    %c0_33 = arith.constant 0 : index
    %c0_34 = arith.constant 0 : index
    %c0_35 = arith.constant 0 : index
    %43 = vector.load %arg5[%c0_33, %c0_34, %c0_35] : memref<4x32x32xbf16, #tpu.memory_space<vmem>>, vector<1x32x32xbf16>
    %44 = vector.shape_cast %43 : vector<1x32x32xbf16> to vector<32x32xbf16>
    %cst_36 = arith.constant dense<0.000000e+00> : vector<64x32xf32>
    %45 = tpu.matmul %42, %44, %cst_36 {dimension_numbers = #tpu.dot_dimension_numbers<[1], [0], [0], [1], [0, 0, 1, 1], [], []>} : vector<64x32xbf16>, vector<32x32xbf16>, vector<64x32xf32> -> vector<64x32xf32>
    %c1_37 = arith.constant 1 : index
    %c0_38 = arith.constant 0 : index
    %46 = tpu.strided_load %arg13[%c1_37, %c0_38] {strides = array<i32: 2, 1>} : memref<136x32xf32, #tpu.memory_space<vmem>>, vector<64x32xf32>
    %47 = arith.truncf %46 : vector<64x32xf32> to vector<64x32xbf16>
    %c1_39 = arith.constant 1 : index
    %c0_40 = arith.constant 0 : index
    %c0_41 = arith.constant 0 : index
    %48 = vector.load %arg5[%c1_39, %c0_40, %c0_41] : memref<4x32x32xbf16, #tpu.memory_space<vmem>>, vector<1x32x32xbf16>
    %49 = vector.shape_cast %48 : vector<1x32x32xbf16> to vector<32x32xbf16>
    %cst_42 = arith.constant dense<0.000000e+00> : vector<64x32xf32>
    %50 = tpu.matmul %47, %49, %cst_42 {dimension_numbers = #tpu.dot_dimension_numbers<[1], [0], [0], [1], [0, 0, 1, 1], [], []>} : vector<64x32xbf16>, vector<32x32xbf16>, vector<64x32xf32> -> vector<64x32xf32>
    %51 = arith.addf %45, %50 : vector<64x32xf32>
    %c2_43 = arith.constant 2 : index
    %c0_44 = arith.constant 0 : index
    %52 = tpu.strided_load %arg13[%c2_43, %c0_44] {strides = array<i32: 2, 1>} : memref<136x32xf32, #tpu.memory_space<vmem>>, vector<64x32xf32>
    %53 = arith.truncf %52 : vector<64x32xf32> to vector<64x32xbf16>
    %c2_45 = arith.constant 2 : index
    %c0_46 = arith.constant 0 : index
    %c0_47 = arith.constant 0 : index
    %54 = vector.load %arg5[%c2_45, %c0_46, %c0_47] : memref<4x32x32xbf16, #tpu.memory_space<vmem>>, vector<1x32x32xbf16>
    %55 = vector.shape_cast %54 : vector<1x32x32xbf16> to vector<32x32xbf16>
    %cst_48 = arith.constant dense<0.000000e+00> : vector<64x32xf32>
    %56 = tpu.matmul %53, %55, %cst_48 {dimension_numbers = #tpu.dot_dimension_numbers<[1], [0], [0], [1], [0, 0, 1, 1], [], []>} : vector<64x32xbf16>, vector<32x32xbf16>, vector<64x32xf32> -> vector<64x32xf32>
    %57 = arith.addf %51, %56 : vector<64x32xf32>
    %c3_49 = arith.constant 3 : index
    %c0_50 = arith.constant 0 : index
    %58 = tpu.strided_load %arg13[%c3_49, %c0_50] {strides = array<i32: 2, 1>} : memref<136x32xf32, #tpu.memory_space<vmem>>, vector<64x32xf32>
    %59 = arith.truncf %58 : vector<64x32xf32> to vector<64x32xbf16>
    %c3_51 = arith.constant 3 : index
    %c0_52 = arith.constant 0 : index
    %c0_53 = arith.constant 0 : index
    %60 = vector.load %arg5[%c3_51, %c0_52, %c0_53] : memref<4x32x32xbf16, #tpu.memory_space<vmem>>, vector<1x32x32xbf16>
    %61 = vector.shape_cast %60 : vector<1x32x32xbf16> to vector<32x32xbf16>
    %cst_54 = arith.constant dense<0.000000e+00> : vector<64x32xf32>
    %62 = tpu.matmul %59, %61, %cst_54 {dimension_numbers = #tpu.dot_dimension_numbers<[1], [0], [0], [1], [0, 0, 1, 1], [], []>} : vector<64x32xbf16>, vector<32x32xbf16>, vector<64x32xf32> -> vector<64x32xf32>
    %63 = arith.addf %57, %62 : vector<64x32xf32>
    %c0_55 = arith.constant 0 : index
    %c0_56 = arith.constant 0 : index
    %64 = vector.load %arg6[%c0_55, %c0_56] : memref<1x32xf32, #tpu.memory_space<vmem>>, vector<1x32xf32>
    %65 = vector.broadcast %64 : vector<1x32xf32> to vector<64x32xf32>
    %66 = arith.addf %63, %65 : vector<64x32xf32>
    %cst_57 = arith.constant 0.000000e+00 : f32
    %67 = vector.broadcast %cst_57 : f32 to vector<64x32xf32>
    %68 = arith.cmpf oge, %66, %67 : vector<64x32xf32>
    %cst_58 = arith.constant 0.00999999977 : f32
    %69 = vector.broadcast %cst_58 : f32 to vector<64x32xf32>
    %70 = arith.mulf %69, %66 : vector<64x32xf32>
    %71 = arith.select %68, %66, %70 : vector<64x32xi1>, vector<64x32xf32>
    %c0_59 = arith.constant 0 : index
    %c0_60 = arith.constant 0 : index
    %72 = vector.load %arg7[%c0_59, %c0_60] : memref<64x1xf32, #tpu.memory_space<vmem>>, vector<64x1xf32>
    %cst_61 = arith.constant 5.000000e-01 : f32
    %73 = vector.broadcast %cst_61 : f32 to vector<64x1xf32>
    %74 = arith.cmpf ogt, %72, %73 : vector<64x1xf32>
    %cst_62 = arith.constant 0.000000e+00 : f32
    %75 = vector.shape_cast %74 : vector<64x1xi1> to vector<64x1xi1>
    %76 = vector.broadcast %75 : vector<64x1xi1> to vector<64x32xi1>
    %77 = vector.broadcast %cst_62 : f32 to vector<64x32xf32>
    %78 = arith.select %76, %71, %77 : vector<64x32xi1>, vector<64x32xf32>
    %c0_63 = arith.constant 0 : index
    %c0_64 = arith.constant 0 : index
    %79 = vector.load %arg14[%c0_63, %c0_64] : memref<72x32xf32, #tpu.memory_space<vmem>>, vector<64x32xf32>
    tpu.vector_store %arg14[%c0_63, %c0_64], %78 {strides = array<i32>} : memref<72x32xf32, #tpu.memory_space<vmem>>, vector<64x32xf32>,
    %cst_65 = arith.constant 0.000000e+00 : f32
    %80 = vector.broadcast %cst_65 : f32 to vector<8x32xf32>
    %c64 = arith.constant 64 : index
    %c0_66 = arith.constant 0 : index
    %81 = vector.load %arg14[%c64, %c0_66] : memref<72x32xf32, #tpu.memory_space<vmem>>, vector<8x32xf32>
    tpu.vector_store %arg14[%c64, %c0_66], %80 {strides = array<i32>} : memref<72x32xf32, #tpu.memory_space<vmem>>, vector<8x32xf32>,
    %c0_67 = arith.constant 0 : index
    %c0_68 = arith.constant 0 : index
    %82 = tpu.strided_load %arg14[%c0_67, %c0_68] {strides = array<i32: 2, 1>} : memref<72x32xf32, #tpu.memory_space<vmem>>, vector<32x32xf32>
    %83 = arith.truncf %82 : vector<32x32xf32> to vector<32x32xbf16>
    %c0_69 = arith.constant 0 : index
    %c0_70 = arith.constant 0 : index
    %c0_71 = arith.constant 0 : index
    %84 = vector.load %arg8[%c0_69, %c0_70, %c0_71] : memref<4x32x32xbf16, #tpu.memory_space<vmem>>, vector<1x32x32xbf16>
    %85 = vector.shape_cast %84 : vector<1x32x32xbf16> to vector<32x32xbf16>
    %cst_72 = arith.constant dense<0.000000e+00> : vector<32x32xf32>
    %86 = tpu.matmul %83, %85, %cst_72 {dimension_numbers = #tpu.dot_dimension_numbers<[1], [0], [0], [1], [0, 0, 1, 1], [], []>} : vector<32x32xbf16>, vector<32x32xbf16>, vector<32x32xf32> -> vector<32x32xf32>
    %c1_73 = arith.constant 1 : index
    %c0_74 = arith.constant 0 : index
    %87 = tpu.strided_load %arg14[%c1_73, %c0_74] {strides = array<i32: 2, 1>} : memref<72x32xf32, #tpu.memory_space<vmem>>, vector<32x32xf32>
    %88 = arith.truncf %87 : vector<32x32xf32> to vector<32x32xbf16>
    %c1_75 = arith.constant 1 : index
    %c0_76 = arith.constant 0 : index
    %c0_77 = arith.constant 0 : index
    %89 = vector.load %arg8[%c1_75, %c0_76, %c0_77] : memref<4x32x32xbf16, #tpu.memory_space<vmem>>, vector<1x32x32xbf16>
    %90 = vector.shape_cast %89 : vector<1x32x32xbf16> to vector<32x32xbf16>
    %cst_78 = arith.constant dense<0.000000e+00> : vector<32x32xf32>
    %91 = tpu.matmul %88, %90, %cst_78 {dimension_numbers = #tpu.dot_dimension_numbers<[1], [0], [0], [1], [0, 0, 1, 1], [], []>} : vector<32x32xbf16>, vector<32x32xbf16>, vector<32x32xf32> -> vector<32x32xf32>
    %92 = arith.addf %86, %91 : vector<32x32xf32>
    %c2_79 = arith.constant 2 : index
    %c0_80 = arith.constant 0 : index
    %93 = tpu.strided_load %arg14[%c2_79, %c0_80] {strides = array<i32: 2, 1>} : memref<72x32xf32, #tpu.memory_space<vmem>>, vector<32x32xf32>
    %94 = arith.truncf %93 : vector<32x32xf32> to vector<32x32xbf16>
    %c2_81 = arith.constant 2 : index
    %c0_82 = arith.constant 0 : index
    %c0_83 = arith.constant 0 : index
    %95 = vector.load %arg8[%c2_81, %c0_82, %c0_83] : memref<4x32x32xbf16, #tpu.memory_space<vmem>>, vector<1x32x32xbf16>
    %96 = vector.shape_cast %95 : vector<1x32x32xbf16> to vector<32x32xbf16>
    %cst_84 = arith.constant dense<0.000000e+00> : vector<32x32xf32>
    %97 = tpu.matmul %94, %96, %cst_84 {dimension_numbers = #tpu.dot_dimension_numbers<[1], [0], [0], [1], [0, 0, 1, 1], [], []>} : vector<32x32xbf16>, vector<32x32xbf16>, vector<32x32xf32> -> vector<32x32xf32>
    %98 = arith.addf %92, %97 : vector<32x32xf32>
    %c3_85 = arith.constant 3 : index
    %c0_86 = arith.constant 0 : index
    %99 = tpu.strided_load %arg14[%c3_85, %c0_86] {strides = array<i32: 2, 1>} : memref<72x32xf32, #tpu.memory_space<vmem>>, vector<32x32xf32>
    %100 = arith.truncf %99 : vector<32x32xf32> to vector<32x32xbf16>
    %c3_87 = arith.constant 3 : index
    %c0_88 = arith.constant 0 : index
    %c0_89 = arith.constant 0 : index
    %101 = vector.load %arg8[%c3_87, %c0_88, %c0_89] : memref<4x32x32xbf16, #tpu.memory_space<vmem>>, vector<1x32x32xbf16>
    %102 = vector.shape_cast %101 : vector<1x32x32xbf16> to vector<32x32xbf16>
    %cst_90 = arith.constant dense<0.000000e+00> : vector<32x32xf32>
    %103 = tpu.matmul %100, %102, %cst_90 {dimension_numbers = #tpu.dot_dimension_numbers<[1], [0], [0], [1], [0, 0, 1, 1], [], []>} : vector<32x32xbf16>, vector<32x32xbf16>, vector<32x32xf32> -> vector<32x32xf32>
    %104 = arith.addf %98, %103 : vector<32x32xf32>
    %c0_91 = arith.constant 0 : index
    %c0_92 = arith.constant 0 : index
    %105 = vector.load %arg9[%c0_91, %c0_92] : memref<1x32xf32, #tpu.memory_space<vmem>>, vector<1x32xf32>
    %106 = vector.broadcast %105 : vector<1x32xf32> to vector<32x32xf32>
    %107 = arith.addf %104, %106 : vector<32x32xf32>
    %cst_93 = arith.constant 0.000000e+00 : f32
    %108 = vector.broadcast %cst_93 : f32 to vector<32x32xf32>
    %109 = arith.cmpf oge, %107, %108 : vector<32x32xf32>
    %cst_94 = arith.constant 0.00999999977 : f32
    %110 = vector.broadcast %cst_94 : f32 to vector<32x32xf32>
    %111 = arith.mulf %110, %107 : vector<32x32xf32>
    %112 = arith.select %109, %107, %111 : vector<32x32xi1>, vector<32x32xf32>
    %c0_95 = arith.constant 0 : index
    %c0_96 = arith.constant 0 : index
    %113 = vector.load %arg15[%c0_95, %c0_96] : memref<32x32xf32, #tpu.memory_space<vmem>>, vector<32x32xf32>
    tpu.vector_store %arg15[%c0_95, %c0_96], %112 {strides = array<i32>} : memref<32x32xf32, #tpu.memory_space<vmem>>, vector<32x32xf32>,
    %cst_97 = arith.constant 0.000000e+00 : f32
    %114 = vector.broadcast %cst_97 : f32 to vector<8x10xf32>
    %c0_98 = arith.constant 0 : index
    %c0_99 = arith.constant 0 : index
    %115 = tpu.strided_load %arg15[%c0_98, %c0_99] {strides = array<i32: 4, 1>} : memref<32x32xf32, #tpu.memory_space<vmem>>, vector<8x32xf32>
    %116 = arith.truncf %115 : vector<8x32xf32> to vector<8x32xbf16>
    %c0_100 = arith.constant 0 : index
    %c0_101 = arith.constant 0 : index
    %c0_102 = arith.constant 0 : index
    %117 = vector.load %arg10[%c0_100, %c0_101, %c0_102] : memref<2x32x10xbf16, #tpu.memory_space<vmem>>, vector<1x32x10xbf16>
    %118 = vector.shape_cast %117 : vector<1x32x10xbf16> to vector<32x10xbf16>
    %cst_103 = arith.constant dense<0.000000e+00> : vector<8x10xf32>
    %119 = tpu.matmul %116, %118, %cst_103 {dimension_numbers = #tpu.dot_dimension_numbers<[1], [0], [0], [1], [0, 0, 1, 1], [], []>} : vector<8x32xbf16>, vector<32x10xbf16>, vector<8x10xf32> -> vector<8x10xf32>
    %120 = arith.addf %114, %119 : vector<8x10xf32>
    %c1_104 = arith.constant 1 : index
    %c0_105 = arith.constant 0 : index
    %121 = tpu.strided_load %arg15[%c1_104, %c0_105] {strides = array<i32: 4, 1>} : memref<32x32xf32, #tpu.memory_space<vmem>>, vector<8x32xf32>
    %122 = arith.truncf %121 : vector<8x32xf32> to vector<8x32xbf16>
    %c1_106 = arith.constant 1 : index
    %c0_107 = arith.constant 0 : index
    %c0_108 = arith.constant 0 : index
    %123 = vector.load %arg10[%c1_106, %c0_107, %c0_108] : memref<2x32x10xbf16, #tpu.memory_space<vmem>>, vector<1x32x10xbf16>
    %124 = vector.shape_cast %123 : vector<1x32x10xbf16> to vector<32x10xbf16>
    %cst_109 = arith.constant dense<0.000000e+00> : vector<8x10xf32>
    %125 = tpu.matmul %122, %124, %cst_109 {dimension_numbers = #tpu.dot_dimension_numbers<[1], [0], [0], [1], [0, 0, 1, 1], [], []>} : vector<8x32xbf16>, vector<32x10xbf16>, vector<8x10xf32> -> vector<8x10xf32>
    %126 = arith.addf %120, %125 : vector<8x10xf32>
    %c0_110 = arith.constant 0 : index
    %c0_111 = arith.constant 0 : index
    %127 = vector.load %arg11[%c0_110, %c0_111] : memref<1x10xf32, #tpu.memory_space<vmem>>, vector<1x10xf32>
    %128 = vector.broadcast %127 : vector<1x10xf32> to vector<8x10xf32>
    %129 = arith.addf %126, %128 : vector<8x10xf32>
    %c0_112 = arith.constant 0 : index
    %c0_113 = arith.constant 0 : index
    %130 = vector.load %arg12[%c0_112, %c0_113] : memref<8x10xf32, #tpu.memory_space<vmem>>, vector<8x10xf32>
    tpu.vector_store %arg12[%c0_112, %c0_113], %129 {strides = array<i32>} : memref<8x10xf32, #tpu.memory_space<vmem>>, vector<8x10xf32>,
    return
  }
  func.func @transform_0(%arg0: i32) -> (i32, i32) {
    %c0_i32 = arith.constant 0 : i32
    %c0_i32_0 = arith.constant 0 : i32
    return %arg0, %c0_i32 : i32, i32
  }
  func.func @transform_1(%arg0: i32) -> (i32, i32, i32) {
    %c0_i32 = arith.constant 0 : i32
    %c0_i32_0 = arith.constant 0 : i32
    %c0_i32_1 = arith.constant 0 : i32
    %c0_i32_2 = arith.constant 0 : i32
    return %c0_i32, %c0_i32_0, %c0_i32_1 : i32, i32, i32
  }
  func.func @transform_2(%arg0: i32) -> (i32, i32) {
    %c0_i32 = arith.constant 0 : i32
    %c0_i32_0 = arith.constant 0 : i32
    %c0_i32_1 = arith.constant 0 : i32
    return %c0_i32, %c0_i32_0 : i32, i32
  }
  func.func @transform_3(%arg0: i32) -> (i32, i32) {
    %c0_i32 = arith.constant 0 : i32
    %c0_i32_0 = arith.constant 0 : i32
    %c0_i32_1 = arith.constant 0 : i32
    return %c0_i32, %c0_i32_0 : i32, i32
  }
  func.func @transform_4(%arg0: i32) -> (i32, i32, i32) {
    %c0_i32 = arith.constant 0 : i32
    %c0_i32_0 = arith.constant 0 : i32
    %c0_i32_1 = arith.constant 0 : i32
    %c0_i32_2 = arith.constant 0 : i32
    return %c0_i32, %c0_i32_0, %c0_i32_1 : i32, i32, i32
  }
  func.func @transform_5(%arg0: i32) -> (i32, i32) {
    %c0_i32 = arith.constant 0 : i32
    %c0_i32_0 = arith.constant 0 : i32
    %c0_i32_1 = arith.constant 0 : i32
    return %c0_i32, %c0_i32_0 : i32, i32
  }
  func.func @transform_6(%arg0: i32) -> (i32, i32) {
    %c0_i32 = arith.constant 0 : i32
    %c0_i32_0 = arith.constant 0 : i32
    %c0_i32_1 = arith.constant 0 : i32
    return %c0_i32, %c0_i32_0 : i32, i32
  }
  func.func @transform_7(%arg0: i32) -> (i32, i32, i32) {
    %c0_i32 = arith.constant 0 : i32
    %c0_i32_0 = arith.constant 0 : i32
    %c0_i32_1 = arith.constant 0 : i32
    %c0_i32_2 = arith.constant 0 : i32
    return %c0_i32, %c0_i32_0, %c0_i32_1 : i32, i32, i32
  }
  func.func @transform_8(%arg0: i32) -> (i32, i32) {
    %c0_i32 = arith.constant 0 : i32
    %c0_i32_0 = arith.constant 0 : i32
    %c0_i32_1 = arith.constant 0 : i32
    return %c0_i32, %c0_i32_0 : i32, i32
  }
  func.func @transform_9(%arg0: i32) -> (i32, i32, i32) {
    %c0_i32 = arith.constant 0 : i32
    %c0_i32_0 = arith.constant 0 : i32
    %c0_i32_1 = arith.constant 0 : i32
    %c0_i32_2 = arith.constant 0 : i32
    return %c0_i32, %c0_i32_0, %c0_i32_1 : i32, i32, i32
  }
  func.func @transform_10(%arg0: i32) -> (i32, i32) {
    %c0_i32 = arith.constant 0 : i32
    %c0_i32_0 = arith.constant 0 : i32
    %c0_i32_1 = arith.constant 0 : i32
    return %c0_i32, %c0_i32_0 : i32, i32
  }
  func.func @transform_11(%arg0: i32) -> (i32, i32) {
    %c0_i32 = arith.constant 0 : i32
    %c0_i32_0 = arith.constant 0 : i32
    return %arg0, %c0_i32 : i32, i32
  }
}

</mosaic_0001>

<bundles_post_ra>
// kernel: tile.18
= control target key start
LH: loop header
LB: loop body
LE: loop exit
PB: predicated region body
PF: predicated region fallthrough
CT: control target
= control target key end

     0   :  { %s22_s0 = inlined_call_operand.vmem [shape: f32[4], index: 0, kind: input, shape index: {}]   ;;  %s23_s1 = inlined_call_operand.vmem [shape: f32[8,4], index: 1, kind: output, shape index: {}]  }
   0x1   :  { %v4_v0 = vld [vmem:[%s22_s0] ss:$0 sm:$0xff] }
   0x2   :  { %5 = vst [vmem:[%s23_s1] sm:$0xff] %v4_v0 }

// kernel: tile.19
= control target key start
LH: loop header
LB: loop body
LE: loop exit
PB: predicated region body
PF: predicated region fallthrough
CT: control target
= control target key end

     0   :  { %s67_s10 = smov 28   ;;  %s68_s11 = smov 20   ;;  %vm3_vm0 = vcmask 31744   ;;  %vm9_vm1 = vcmask 261344   ;;  %vm15_vm2 = vcmask 228544   ;;  %vm21_vm3 = vcmask 195744   ;;  %s111_s0 = inlined_call_operand.vmem [shape: f32[8,4], index: 0, kind: input, shape index: {}]   ;;  %s112_s1 = inlined_call_operand.vmem [shape: f32[1,32], index: 1, kind: output, shape index: {}]  }
   0x1   :  { %v53_v0 = vld [vmem:[%s111_s0 + $0x7] sm:$0x1]   ;;  %v55_v1 = vld [vmem:[%s111_s0 + $0x5] sm:$0x1]   ;;  %v54_v2 = vld [vmem:[%s111_s0 + $0x6] sm:$0x1]  }
   0x2   :  { %7 = vrot.lane.b32.xlu0 %v53_v0, %s67_s10  ;;  %19 = vrot.lane.b32.xlu1 %v55_v1, %s68_s11  ;;  %v56_v3 = vld [vmem:[%s111_s0 + $0x4] sm:$0x1]   ;;  %v2_v4 = vld [vmem:[%s111_s0] sm:$0x1]   ;;  %s69_s18 = smov 24   ;;  %s70_s19 = smov 16  }
   0x3   :  { %4 = vst.msk [vmem:[#allocation0] sm:$0x1] %vm3_vm0, %v2_v4   ;;  %v57_v5 = vld [vmem:[%s111_s0 + $0x3] sm:$0x1]   ;;  %v58_v6 = vld [vmem:[%s111_s0 + $0x2] sm:$0x1]  }
   0x4   :  { %s71_s24 = smov 12   ;;  %s72_s25 = smov 8   ;;  %v59_v7 = vld [vmem:[%s111_s0 + $0x1] sm:$0x1]   ;;  %vm27_vm4 = vcmask 162944   ;;  %vm33_vm5 = vcmask 130144  }
   0x5   :  { %s73_s0 = smov 4   ;;  %vm39_vm6 = vcmask 97344   ;;  %vm45_vm7 = vcmask 64544  }
   0x6   :  { %13 = vrot.lane.b32.xlu0 %v54_v2, %s69_s18  ;;  %25 = vrot.lane.b32.xlu1 %v56_v3, %s70_s19 }
   0xa   :  { %31 = vrot.lane.b32.xlu0 %v57_v5, %s71_s24  ;;  %37 = vrot.lane.b32.xlu1 %v58_v6, %s72_s25 }
   0xe   :  { %43 = vrot.lane.b32.xlu0 %v59_v7, %s73_s0 }
  0x74   :  { %v8_v8 = vpop.permute.xlu0 %7   ;;  %v20_v9 = vpop.permute.xlu1 %19  }
  0x75   :  { %10 = vst.msk [vmem:[#allocation0] sm:$0x1] %vm9_vm1, %v8_v8  }
  0x78   :  { %v14_v10 = vpop.permute.xlu0 %13   ;;  %v26_v11 = vpop.permute.xlu1 %25  }
  0x79   :  { %16 = vst.msk [vmem:[#allocation0] sm:$0x1] %vm15_vm2, %v14_v10  }
  0x7a   :  { %22 = vst.msk [vmem:[#allocation0] sm:$0x1] %vm21_vm3, %v20_v9  }
  0x7b   :  { %28 = vst.msk [vmem:[#allocation0] sm:$0x1] %vm27_vm4, %v26_v11  }
  0x7c   :  { %v32_v12 = vpop.permute.xlu0 %31   ;;  %v38_v13 = vpop.permute.xlu1 %37  }
  0x7d   :  { %34 = vst.msk [vmem:[#allocation0] sm:$0x1] %vm33_vm5, %v32_v12  }
  0x7e   :  { %40 = vst.msk [vmem:[#allocation0] sm:$0x1] %vm39_vm6, %v38_v13  }
  0x80   :  { %v44_v14 = vpop.permute.xlu0 %43  }
  0x81   :  { %46 = vst.msk [vmem:[#allocation0] sm:$0x1] %vm45_vm7, %v44_v14  }
  0x88   :  { %v50_v15 = vld [vmem:[#allocation0] sm:$0x1] }
  0x89   :  { %52 = vst [vmem:[%s112_s1] sm:$0x1] %v50_v15 }

// kernel: tile.23
= control target key start
LH: loop header
LB: loop body
LE: loop exit
PB: predicated region body
PF: predicated region fallthrough
CT: control target
= control target key end

     0   :  { %s22_s0 = inlined_call_operand.vmem [shape: f32[8], index: 0, kind: input, shape index: {}]   ;;  %s23_s1 = inlined_call_operand.vmem [shape: f32[4,8], index: 1, kind: output, shape index: {}]  }
   0x1   :  { %v4_v0 = vld [vmem:[%s22_s0] ss:$0 sm:$0xff] }
   0x2   :  { %5 = vst [vmem:[%s23_s1] sm:$0xf] %v4_v0 }

// kernel: tile.24
= control target key start
LH: loop header
LB: loop body
LE: loop exit
PB: predicated region body
PF: predicated region fallthrough
CT: control target
= control target key end

     0   :  { %vm7_vm0 = vcmask 64512   ;;  %s37_s8 = smov 8   ;;  %s38_s9 = smov 16   ;;  %vm13_vm1 = vcmask 261312   ;;  %vm19_vm2 = vcmask 195712   ;;  %vm25_vm3 = vcmask 130112   ;;  %s55_s0 = inlined_call_operand.vmem [shape: f32[4,8], index: 0, kind: input, shape index: {}]   ;;  %s56_s1 = inlined_call_operand.vmem [shape: f32[1,32], index: 1, kind: output, shape index: {}]  }
   0x1   :  { %v4_v0 = vld [vmem:[%s55_s0] sm:$0xf]  ;;  %s36_s0 = smov 24  }
   0x2   :  { %5 = vst [vmem:[#allocation1] sm:$0xf] %v4_v0 }
   0x9   :  { %v10_v1 = vld [vmem:[#allocation1 + $0x3] sm:$0x1]   ;;  %v22_v2 = vld [vmem:[#allocation1 + $0x1] sm:$0x1]   ;;  %v6_v3 = vld [vmem:[#allocation1] sm:$0x1]  }
   0xa   :  { %11 = vrot.lane.b32.xlu0 %v10_v1, %s36_s0  ;;  %23 = vrot.lane.b32.xlu1 %v22_v2, %s37_s8  ;;  %v16_v4 = vld [vmem:[#allocation1 + $0x2] sm:$0x1]   ;;  %8 = vst.msk [vmem:[#allocation0] sm:$0x1] %vm7_vm0, %v6_v3  }
   0xe   :  { %17 = vrot.lane.b32.xlu0 %v16_v4, %s38_s9 }
  0x7c   :  { %v12_v5 = vpop.permute.xlu0 %11   ;;  %v24_v6 = vpop.permute.xlu1 %23  }
  0x7d   :  { %14 = vst.msk [vmem:[#allocation0] sm:$0x1] %vm13_vm1, %v12_v5  }
  0x80   :  { %v18_v7 = vpop.permute.xlu0 %17  }
  0x81   :  { %20 = vst.msk [vmem:[#allocation0] sm:$0x1] %vm19_vm2, %v18_v7  }
  0x82   :  { %26 = vst.msk [vmem:[#allocation0] sm:$0x1] %vm25_vm3, %v24_v6  }
  0x89   :  { %v30_v8 = vld [vmem:[#allocation0] sm:$0x1] }
  0x8a   :  { %32 = vst [vmem:[%s56_s1] sm:$0x1] %v30_v8 }

// kernel: tile.28
= control target key start
LH: loop header
LB: loop body
LE: loop exit
PB: predicated region body
PF: predicated region fallthrough
CT: control target
= control target key end

     0   :  { %s22_s0 = inlined_call_operand.vmem [shape: f32[16], index: 0, kind: input, shape index: {}]   ;;  %s23_s1 = inlined_call_operand.vmem [shape: f32[2,16], index: 1, kind: output, shape index: {}]  }
   0x1   :  { %v4_v0 = vld [vmem:[%s22_s0] ss:$0 sm:$0xff] }
   0x2   :  { %5 = vst [vmem:[%s23_s1] sm:$0x3] %v4_v0 }

// kernel: tile.29
= control target key start
LH: loop header
LB: loop body
LE: loop exit
PB: predicated region body
PF: predicated region fallthrough
CT: control target
= control target key end

     0   :  { %vm7_vm0 = vcmask 130048   ;;  %vm13_vm1 = vcmask 261248   ;;  %s39_s0 = inlined_call_operand.vmem [shape: f32[2,16], index: 0, kind: input, shape index: {}]   ;;  %s40_s1 = inlined_call_operand.vmem [shape: f32[1,32], index: 1, kind: output, shape index: {}]  }
   0x1   :  { %v4_v0 = vld [vmem:[%s39_s0] sm:$0x3]  ;;  %s22_s0 = smov 16  }
   0x2   :  { %5 = vst [vmem:[#allocation1] sm:$0x3] %v4_v0 }
   0x9   :  { %v10_v1 = vld [vmem:[#allocation1 + $0x1] sm:$0x1]   ;;  %v6_v2 = vld [vmem:[#allocation1] sm:$0x1]  }
   0xa   :  { %11 = vrot.lane.b32.xlu0 %v10_v1, %s22_s0  ;;  %8 = vst.msk [vmem:[#allocation0] sm:$0x1] %vm7_vm0, %v6_v2  }
  0x7c   :  { %v12_v3 = vpop.permute.xlu0 %11  }
  0x7d   :  { %14 = vst.msk [vmem:[#allocation0] sm:$0x1] %vm13_vm1, %v12_v3  }
  0x84   :  { %v18_v4 = vld [vmem:[#allocation0] sm:$0x1] }
  0x85   :  { %20 = vst [vmem:[%s40_s1] sm:$0x1] %v18_v4 }

// kernel: classifier_forward.1
= control target key start
LH: loop header
LB: loop body
LE: loop exit
PB: predicated region body
PF: predicated region fallthrough
CT: control target
= control target key end

     0   :  { %vm129_vm0 = vcmask 130048   ;;  %v2596_v1 = vmov 0   ;;  %s3183_s1 = inlined_call_operand.vmem [shape: bf16[4,16,32], index: 1, kind: input, shape index: {}]   ;;  %s3184_s0 = inlined_call_operand.vmem [shape: f32[264,16], index: 0, kind: input, shape index: {}]   ;;  %s3185_s3 = inlined_call_operand.vmem [shape: f32[128,1], index: 3, kind: input, shape index: {}]   ;;  %s3186_s6 = inlined_call_operand.vmem [shape: f32[64,1], index: 6, kind: input, shape index: {}]   ;;  %s3187_s4 = inlined_call_operand.vmem [shape: bf16[4,32,32], index: 4, kind: input, shape index: {}]   ;;  %s3188_s2 = inlined_call_operand.vmem [shape: f32[1,32], index: 2, kind: input, shape index: {}]   ;;  %s3189_s7 = inlined_call_operand.vmem [shape: bf16[4,32,32], index: 7, kind: input, shape index: {}]   ;;  %s3190_s5 = inlined_call_operand.vmem [shape: f32[1,32], index: 5, kind: input, shape index: {}]   ;;  %s3191_s9 = inlined_call_operand.vmem [shape: bf16[2,32,10], index: 9, kind: input, shape index: {}]   ;;  %s3192_s8 = inlined_call_operand.vmem [shape: f32[1,32], index: 8, kind: input, shape index: {}]   ;;  %s3193_s10 = inlined_call_operand.vmem [shape: f32[1,10], index: 10, kind: input, shape index: {}]   ;;  %s3194_s11 = inlined_call_operand.vmem [shape: f32[8,10], index: 11, kind: output, shape index: {}]  }
   0x1   :  { %v2572_v0 = vld [vmem:[%s3183_s1 + $0x8] sm:$0xff]   ;;  %2571 = vset.pattern.permute.xlu1 %v2596_v1  ;;  %2570 = vset.pattern.permute.xlu0 %v2596_v1  ;;  %v2064_v3 = vld [vmem:[%s3184_s0 + $0x11] ss:$2 sm:$0xff]  ;;  %v2573_v8 = vld [vmem:[%s3183_s1] sm:$0xff]  }
   0x2   :  { %v2063_v2 = vld [vmem:[%s3184_s0 + $0x1] ss:$2 sm:$0xff]  ;;  %2313 = vmatprep.subr.bf16.mxu0 %v2572_v0  ;;  %v2066_v6 = vld [vmem:[%s3184_s0 + $0x31] ss:$2 sm:$0xff]  ;;  %2481 = vmatprep.subr.bf16.mxu1 %v2572_v0  ;;  %v39_v21 = vld [vmem:[%s3184_s0] ss:$2 sm:$0xff] }
   0x3   :  { %v2065_v4 = vld [vmem:[%s3184_s0 + $0x21] ss:$2 sm:$0xff]  ;;  %v112_v5 = vpack.c.bf16 %v2064_v3, %v2063_v2  ;;  %2314 = vmatpush3.bf16.msra.mxu0 %v2572_v0  ;;  %v2068_v10 = vld [vmem:[%s3184_s0 + $0x51] ss:$2 sm:$0xff]  ;;  %2482 = vmatpush3.bf16.msra.mxu1 %v2572_v0  ;;  %v2048_v22 = vld [vmem:[%s3184_s0 + $0x10] ss:$2 sm:$0xff] }
   0x4   :  { %v113_v7 = vpack.c.bf16 %v2066_v6, %v2065_v4  ;;  %v2067_v9 = vld [vmem:[%s3184_s0 + $0x41] ss:$2 sm:$0xff]  ;;  %2331 = vmatprep.subr.bf16.mxu0 %v2573_v8  ;;  %v2070_v13 = vld [vmem:[%s3184_s0 + $0x71] ss:$2 sm:$0xff]  ;;  %v70_v24 = vpack.c.bf16 %v2048_v22, %v39_v21  ;;  %v2049_v25 = vld [vmem:[%s3184_s0 + $0x20] ss:$2 sm:$0xff] }
   0x5   :  { %2315 = vmatprep.mubr.msk.bf16.mxu0 %vm129_vm0, %v112_v5  ;;  %v114_v11 = vpack.c.bf16 %v2068_v10, %v2067_v9  ;;  %v2069_v12 = vld [vmem:[%s3184_s0 + $0x61] ss:$2 sm:$0xff]  ;;  %v2072_v15 = vld [vmem:[%s3184_s0 + $0x91] ss:$2 sm:$0xff]  ;;  %v2050_v26 = vld [vmem:[%s3184_s0 + $0x30] ss:$2 sm:$0xff] }
   0x6   :  { %2316 = vmatmul.mubr.msk.bf16.vlgmr.msra.gmra.mrb[0].mxu0 %vm129_vm0, %v113_v7  ;;  %v2071_v14 = vld [vmem:[%s3184_s0 + $0x81] ss:$2 sm:$0xff]  ;;  %v2574_v16 = vld [vmem:[%s3183_s1 + $0x10] sm:$0xff]   ;;  %v115_v17 = vpack.c.bf16 %v2070_v13, %v2069_v12  ;;  %v2051_v27 = vld [vmem:[%s3184_s0 + $0x40] ss:$2 sm:$0xff]  ;;  %v71_v37 = vpack.c.bf16 %v2050_v26, %v2049_v25 }
   0x7   :  { %2332 = vmatpush3.bf16.msra.mxu0 %v2573_v8  ;;  %2319 = vmatprep.mubr.msk.bf16.mxu0 %vm129_vm0, %v114_v11  ;;  %v116_v18 = vpack.c.bf16 %v2072_v15, %v2071_v14  ;;  %v2073_v19 = vld [vmem:[%s3184_s0 + $0xa1] ss:$2 sm:$0xff]  ;;  %v2074_v20 = vld [vmem:[%s3184_s0 + $0xb1] ss:$2 sm:$0xff]  ;;  %v2052_v28 = vld [vmem:[%s3184_s0 + $0x50] ss:$2 sm:$0xff] }
   0x8   :  { %2349 = vmatprep.subr.bf16.mxu0 %v2574_v16  ;;  %v117_v23 = vpack.c.bf16 %v2074_v20, %v2073_v19  ;;  %v2075_v29 = vld [vmem:[%s3184_s0 + $0xc1] ss:$2 sm:$0xff]  ;;  %v2076_v30 = vld [vmem:[%s3184_s0 + $0xd1] ss:$2 sm:$0xff]  ;;  %v72_v38 = vpack.c.bf16 %v2052_v28, %v2051_v27  ;;  %v2053_v48 = vld [vmem:[%s3184_s0 + $0x60] ss:$2 sm:$0xff] }
   0x9   :  { %v2077_v31 = vld [vmem:[%s3184_s0 + $0xe1] ss:$2 sm:$0xff]  ;;  %v2078_v32 = vld [vmem:[%s3184_s0 + $0xf1] ss:$2 sm:$0xff]  ;;  %v118_v33 = vpack.c.bf16 %v2076_v30, %v2075_v29  ;;  %v2054_v49 = vld [vmem:[%s3184_s0 + $0x70] ss:$2 sm:$0xff] }
   0xa   :  { %v119_v34 = vpack.c.bf16 %v2078_v32, %v2077_v31  ;;  %v823_v35 = vld [vmem:[%s3185_s3 + $0x10] sm:$0xff]  ;;  %v821_v36 = vld [vmem:[%s3185_s3] sm:$0xff]  ;;  %v824_v39 = vld [vmem:[%s3185_s3 + $0x18] sm:$0xff]  ;;  %v73_v55 = vpack.c.bf16 %v2054_v49, %v2053_v48 }
   0xb   :  { %2327 = vmatprep.mubr.msk.bf16.mxu1 %vm129_vm0, %v118_v33  ;;  %vm839_vm1 = vcmp.gt.f32.partialorder %v823_v35, 0.5  ;;  %vm837_vm2 = vcmp.gt.f32.partialorder %v821_v36, 0.5  ;;  %v822_v40 = vld [vmem:[%s3185_s3 + $0x8] sm:$0xff]  ;;  %vm840_vm3 = vcmp.gt.f32.partialorder %v824_v39, 0.5  ;;  %v2765_v44 = vld [vmem:[%s3183_s1 + $0x18] sm:$0xff]   ;;  %v825_v45 = vld [vmem:[%s3185_s3 + $0x20] sm:$0xff] }
   0xc   :  { %2328 = vmatmul.mubr.msk.bf16.vlgmr.msra.gmra.mrb[0].mxu1 %vm129_vm0, %v119_v34  ;;  %v855_v41 = vsel %vm839_vm1, 1, %v2596_v1  ;;  %v853_v42 = vsel %vm837_vm2, 1, %v2596_v1  ;;  %vm838_vm4 = vcmp.gt.f32.partialorder %v822_v40, 0.5  ;;  %v826_v43 = vld [vmem:[%s3185_s3 + $0x28] sm:$0xff]  ;;  %v856_v46 = vsel %vm840_vm3, 1, %v2596_v1  ;;  %v828_v50 = vld [vmem:[%s3185_s3 + $0x38] sm:$0xff] }
   0xd   :  { %876 = vperm.xlu1 %2571, %v855_v41   ;;  %870 = vperm.xlu0 %2570, %v853_v42   ;;  %v854_v47 = vsel %vm838_vm4, 1, %v2596_v1  ;;  %vm842_vm5 = vcmp.gt.f32.partialorder %v826_v43, 0.5  ;;  %vm841_vm6 = vcmp.gt.f32.partialorder %v825_v45, 0.5  ;;  %v2055_v51 = vld [vmem:[%s3184_s0 + $0x80] ss:$2 sm:$0xff]  ;;  %v827_v53 = vld [vmem:[%s3185_s3 + $0x30] sm:$0xff] }
   0xe   :  { %2320 = vmatmul.mubr.msk.bf16.gmra.mrb[4].mxu0 %vm129_vm0, %v115_v17  ;;  %v2056_v52 = vld [vmem:[%s3184_s0 + $0x90] ss:$2 sm:$0xff]  ;;  %v858_v54 = vsel %vm842_vm5, 1, %v2596_v1  ;;  %v857_v56 = vsel %vm841_vm6, 1, %v2596_v1  ;;  %vm844_vm7 = vcmp.gt.f32.partialorder %v828_v50, 0.5  ;;  %vm843_vm8 = vcmp.gt.f32.partialorder %v827_v53, 0.5 }
   0xf   :  { %2323 = vmatprep.mubr.msk.bf16.mxu0 %vm129_vm0, %v116_v18  ;;  %v74_v57 = vpack.c.bf16 %v2056_v52, %v2055_v51  ;;  %v830_v58 = vld [vmem:[%s3185_s3 + $0x48] sm:$0xff]  ;;  %v829_v59 = vld [vmem:[%s3185_s3 + $0x40] sm:$0xff]  ;;  %v860_v60 = vsel %vm844_vm7, 1, %v2596_v1  ;;  %v859_v61 = vsel %vm843_vm8, 1, %v2596_v1  ;;  %v2058_v63 = vld [vmem:[%s3184_s0 + $0xb0] ss:$2 sm:$0xff] }
  0x10   :  { %vm846_vm9 = vcmp.gt.f32.partialorder %v830_v58, 0.5  ;;  %v2057_v62 = vld [vmem:[%s3184_s0 + $0xa0] ss:$2 sm:$0xff]  ;;  %vm845_vm10 = vcmp.gt.f32.partialorder %v829_v59, 0.5  ;;  %v832_v0 = vld [vmem:[%s3185_s3 + $0x58] sm:$0xff]  ;;  %v831_v4 = vld [vmem:[%s3185_s3 + $0x50] sm:$0xff] }
  0x11   :  { %879 = vperm.xlu1 %2571, %v856_v46   ;;  %873 = vperm.xlu0 %2570, %v854_v47   ;;  %v2059_v2 = vld [vmem:[%s3184_s0 + $0xc0] ss:$2 sm:$0xff]  ;;  %v2060_v3 = vld [vmem:[%s3184_s0 + $0xd0] ss:$2 sm:$0xff]  ;;  %v862_v5 = vsel %vm846_vm9, 1, %v2596_v1  ;;  %v75_v6 = vpack.c.bf16 %v2058_v63, %v2057_v62  ;;  %v861_v7 = vsel %vm845_vm10, 1, %v2596_v1 }
  0x12   :  { %vm848_vm11 = vcmp.gt.f32.partialorder %v832_v0, 0.5  ;;  %v76_v8 = vpack.c.bf16 %v2060_v3, %v2059_v2  ;;  %vm847_vm12 = vcmp.gt.f32.partialorder %v831_v4, 0.5  ;;  %v834_v9 = vld [vmem:[%s3185_s3 + $0x68] sm:$0xff]  ;;  %v833_v10 = vld [vmem:[%s3185_s3 + $0x60] sm:$0xff]  ;;  %v2062_v14 = vld [vmem:[%s3184_s0 + $0xf0] ss:$2 sm:$0xff] }
  0x13   :  { %v864_v11 = vsel %vm848_vm11, 1, %v2596_v1  ;;  %v863_v12 = vsel %vm847_vm12, 1, %v2596_v1  ;;  %vm850_vm13 = vcmp.gt.f32.partialorder %v834_v9, 0.5  ;;  %v2061_v13 = vld [vmem:[%s3184_s0 + $0xe0] ss:$2 sm:$0xff]  ;;  %vm849_vm14 = vcmp.gt.f32.partialorder %v833_v10, 0.5 }
  0x14   :  { %v836_v15 = vld [vmem:[%s3185_s3 + $0x78] sm:$0xff]  ;;  %v835_v18 = vld [vmem:[%s3185_s3 + $0x70] sm:$0xff]  ;;  %v866_v19 = vsel %vm850_vm13, 1, %v2596_v1  ;;  %v77_v20 = vpack.c.bf16 %v2062_v14, %v2061_v13  ;;  %v865_v21 = vsel %vm849_vm14, 1, %v2596_v1  ;;  %vm949_vm10 = vcmask 261120  }
  0x15   :  { %885 = vperm.xlu1 %2571, %v858_v54   ;;  %882 = vperm.xlu0 %2570, %v857_v56   ;;  %v2100_v17 = vld [vmem:[%s3184_s0 + $0x12] ss:$2 sm:$0xff]  ;;  %vm852_vm15 = vcmp.gt.f32.partialorder %v836_v15, 0.5  ;;  %vm851_vm1 = vcmp.gt.f32.partialorder %v835_v18, 0.5  ;;  %v2101_v27 = vld [vmem:[%s3184_s0 + $0x22] ss:$2 sm:$0xff] }
  0x16   :  { %2324 = vmatmul.mubr.msk.bf16.gmra.mrb[8].mxu0 %vm129_vm0, %v117_v23  ;;  %v1477_v23 = vld [vmem:[%s3186_s6 + $0x8] sm:$0xff]  ;;  %v868_v25 = vsel %vm852_vm15, 1, %v2596_v1  ;;  %v867_v26 = vsel %vm851_vm1, 1, %v2596_v1  ;;  %v2102_v28 = vld [vmem:[%s3184_s0 + $0x32] ss:$2 sm:$0xff] }
  0x17   :  { %2333 = vmatprep.mubr.msk.bf16.mxu0 %vm129_vm0, %v70_v24  ;;  %v1476_v24 = vld [vmem:[%s3186_s6] sm:$0xff]  ;;  %vm1485_vm2 = vcmp.gt.f32.partialorder %v1477_v23, 0.5  ;;  %v1479_v29 = vld [vmem:[%s3186_s6 + $0x18] sm:$0xff]  ;;  %v1478_v32 = vld [vmem:[%s3186_s6 + $0x10] sm:$0xff]  ;;  %v411_v34 = vpack.c.bf16 %v2102_v28, %v2101_v27 }
  0x18   :  { %vm1484_vm3 = vcmp.gt.f32.partialorder %v1476_v24, 0.5  ;;  %v2103_v30 = vld [vmem:[%s3184_s0 + $0x42] ss:$2 sm:$0xff]  ;;  %v2104_v31 = vld [vmem:[%s3184_s0 + $0x52] ss:$2 sm:$0xff]  ;;  %v1493_v33 = vsel %vm1485_vm2, 1, %v2596_v1 }
  0x19   :  { %891 = vperm.xlu1 %2571, %v860_v60   ;;  %888 = vperm.xlu0 %2570, %v859_v61   ;;  %v1492_v35 = vsel %vm1484_vm3, 1, %v2596_v1  ;;  %vm1487_vm4 = vcmp.gt.f32.partialorder %v1479_v29, 0.5  ;;  %v412_v36 = vpack.c.bf16 %v2104_v31, %v2103_v30  ;;  %vm1486_vm5 = vcmp.gt.f32.partialorder %v1478_v32, 0.5  ;;  %v2105_v41 = vld [vmem:[%s3184_s0 + $0x62] ss:$2 sm:$0xff]  ;;  %v1483_v43 = vld [vmem:[%s3186_s6 + $0x38] sm:$0xff] }
  0x1a   :  { %v1495_v39 = vsel %vm1487_vm4, 1, %v2596_v1  ;;  %v1494_v40 = vsel %vm1486_vm5, 1, %v2596_v1  ;;  %v2106_v42 = vld [vmem:[%s3184_s0 + $0x72] ss:$2 sm:$0xff]  ;;  %v2107_v45 = vld [vmem:[%s3184_s0 + $0x82] ss:$2 sm:$0xff] }
  0x1b   :  { %v1482_v46 = vld [vmem:[%s3186_s6 + $0x30] sm:$0xff]  ;;  %v413_v48 = vpack.c.bf16 %v2106_v42, %v2105_v41  ;;  %vm1491_vm8 = vcmp.gt.f32.partialorder %v1483_v43, 0.5  ;;  %v2577_v23 = vld [vmem:[%s3187_s4 + $0x18] sm:$0xff]   ;;  %v3006_v24 = vld [vmem:[%s3187_s4] sm:$0xff]  }
  0x1c   :  { %vm1490_vm9 = vcmp.gt.f32.partialorder %v1482_v46, 0.5  ;;  %v1499_v51 = vsel %vm1491_vm8, 1, %v2596_v1  ;;  %v2109_v53 = vld [vmem:[%s3184_s0 + $0xa2] ss:$2 sm:$0xff]  ;;  %v2110_v54 = vld [vmem:[%s3184_s0 + $0xb2] ss:$2 sm:$0xff] }
  0x1d   :  { %897 = vperm.xlu1 %2571, %v862_v5   ;;  %894 = vperm.xlu0 %2570, %v861_v7   ;;  %v1498_v52 = vsel %vm1490_vm9, 1, %v2596_v1  ;;  %v2112_v56 = vld [vmem:[%s3184_s0 + $0xd2] ss:$2 sm:$0xff]  ;;  %v2113_v58 = vld [vmem:[%s3184_s0 + $0xe2] ss:$2 sm:$0xff] }
  0x1e   :  { %2334 = vmatmul.mubr.msk.bf16.vlgmr.msra.gmra.mrb[0].mxu0 %vm129_vm0, %v71_v37  ;;  %v1481_v37 = vld [vmem:[%s3186_s6 + $0x28] sm:$0xff]  ;;  %v2114_v59 = vld [vmem:[%s3184_s0 + $0xf2] ss:$2 sm:$0xff]  ;;  %v2127_v61 = vld [vmem:[%s3184_s0 + $0x13] ss:$2 sm:$0xff] }
  0x1f   :  { %2350 = vmatpush3.bf16.msra.mxu0 %v2574_v16  ;;  %2337 = vmatprep.mubr.msk.bf16.mxu0 %vm129_vm0, %v72_v38  ;;  %v2099_v16 = vld [vmem:[%s3184_s0 + $0x2] ss:$2 sm:$0xff]  ;;  %vm1489_vm6 = vcmp.gt.f32.partialorder %v1481_v37, 0.5  ;;  %v2126_v60 = vld [vmem:[%s3184_s0 + $0x3] ss:$2 sm:$0xff]  ;;  %v417_v62 = vpack.c.bf16 %v2114_v59, %v2113_v58 }
  0x20   :  { %2367 = vmatprep.subr.bf16.mxu0 %v2765_v44  ;;  %v410_v22 = vpack.c.bf16 %v2100_v17, %v2099_v16  ;;  %v1480_v38 = vld [vmem:[%s3186_s6 + $0x20] sm:$0xff]  ;;  %v1497_v47 = vsel %vm1489_vm6, 1, %v2596_v1  ;;  %v596_v63 = vpack.c.bf16 %v2127_v61, %v2126_v60 }
  0x21   :  { %903 = vperm.xlu1 %2571, %v864_v11   ;;  %900 = vperm.xlu0 %2570, %v863_v12   ;;  %vm1488_vm7 = vcmp.gt.f32.partialorder %v1480_v38, 0.5  ;;  %v2128_v0 = vld [vmem:[%s3184_s0 + $0x23] ss:$2 sm:$0xff]  ;;  %v2129_v2 = vld [vmem:[%s3184_s0 + $0x33] ss:$2 sm:$0xff] }
  0x22   :  { %v1496_v49 = vsel %vm1488_vm7, 1, %v2596_v1  ;;  %v415_v1 = vpack.c.bf16 %v2110_v54, %v2109_v53  ;;  %v2130_v3 = vld [vmem:[%s3184_s0 + $0x43] ss:$2 sm:$0xff]  ;;  %v2131_v4 = vld [vmem:[%s3184_s0 + $0x53] ss:$2 sm:$0xff]  ;;  %v597_v5 = vpack.c.bf16 %v2129_v2, %v2128_v0 }
  0x23   :  { %v2132_v7 = vld [vmem:[%s3184_s0 + $0x63] ss:$2 sm:$0xff]  ;;  %v2135_v10 = vld [vmem:[%s3184_s0 + $0x93] ss:$2 sm:$0xff] }
  0x24   :  { %v2134_v9 = vld [vmem:[%s3184_s0 + $0x83] ss:$2 sm:$0xff]  ;;  %v2137_v14 = vld [vmem:[%s3184_s0 + $0xb3] ss:$2 sm:$0xff] }
  0x25   :  { %909 = vperm.xlu1 %2571, %v866_v19   ;;  %906 = vperm.xlu0 %2570, %v865_v21   ;;  %v600_v12 = vpack.c.bf16 %v2135_v10, %v2134_v9  ;;  %v2136_v13 = vld [vmem:[%s3184_s0 + $0xa3] ss:$2 sm:$0xff]  ;;  %v2139_v16 = vld [vmem:[%s3184_s0 + $0xd3] ss:$2 sm:$0xff] }
  0x26   :  { %2338 = vmatmul.mubr.msk.bf16.gmra.mrb[4].mxu0 %vm129_vm0, %v73_v55  ;;  %v2111_v55 = vld [vmem:[%s3184_s0 + $0xc2] ss:$2 sm:$0xff]  ;;  %v2138_v15 = vld [vmem:[%s3184_s0 + $0xc3] ss:$2 sm:$0xff]  ;;  %v601_v17 = vpack.c.bf16 %v2137_v14, %v2136_v13 }
  0x27   :  { %2341 = vmatprep.mubr.msk.bf16.mxu0 %vm129_vm0, %v74_v57  ;;  %v416_v57 = vpack.c.bf16 %v2112_v56, %v2111_v55  ;;  %v602_v18 = vpack.c.bf16 %v2139_v16, %v2138_v15  ;;  %v2140_v19 = vld [vmem:[%s3184_s0 + $0xe3] ss:$2 sm:$0xff] }
  0x29   :  { %915 = vperm.xlu1 %2571, %v868_v25   ;;  %912 = vperm.xlu0 %2570, %v867_v26   ;;  %v2597_v25 = vmov 0.0  }
  0x2a   :  { %966 = vst.msk [vmem:[#allocation2 + $0x80] sm:$0xff] %vm949_vm10, %v2597_v25  ;;  %1548 = vst.msk [vmem:[#allocation3 + $0x40] sm:$0xff] %vm949_vm10, %v2597_v25 }
  0x2d   :  { %1504 = vperm.xlu1 %2571, %v1493_v33   ;;  %1501 = vperm.xlu0 %2570, %v1492_v35  }
  0x2e   :  { %2342 = vmatmul.mubr.msk.bf16.gmra.mrb[8].mxu0 %vm129_vm0, %v75_v6  ;;  %v598_v6 = vpack.c.bf16 %v2131_v4, %v2130_v3 }
  0x2f   :  { %2345 = vmatprep.mubr.msk.bf16.mxu0 %vm129_vm0, %v76_v8  ;;  %v2133_v8 = vld [vmem:[%s3184_s0 + $0x73] ss:$2 sm:$0xff] }
  0x30   :  { %v599_v11 = vpack.c.bf16 %v2133_v8, %v2132_v7 }
  0x31   :  { %1510 = vperm.xlu1 %2571, %v1495_v39   ;;  %1507 = vperm.xlu0 %2570, %v1494_v40  }
  0x35   :  { %1516 = vperm.xlu1 %2571, %v1497_v47   ;;  %1513 = vperm.xlu0 %2570, %v1496_v49  }
  0x36   :  { %2346 = vmatmul.mubr.msk.bf16.gmra.mrb[12].mxu0 %vm129_vm0, %v77_v20  ;;  %v2141_v20 = vld [vmem:[%s3184_s0 + $0xf3] ss:$2 sm:$0xff] }
  0x37   :  { %2351 = vmatprep.mubr.msk.bf16.mxu0 %vm129_vm0, %v410_v22  ;;  %v603_v21 = vpack.c.bf16 %v2141_v20, %v2140_v19  ;;  %v2576_v22 = vld [vmem:[%s3187_s4 + $0x10] sm:$0xff]  }
  0x38   :  { %2385 = vmatprep.subr.bf16.mxu1 %v2576_v22 }
  0x39   :  { %1522 = vperm.xlu1 %2571, %v1499_v51   ;;  %1519 = vperm.xlu0 %2570, %v1498_v52  }
  0x3a   :  { %2386 = vmatpush3.bf16.msra.mxu1 %v2576_v22 }
  0x3b   :  { %2387 = vmatprep.subr.bf16.mxu1 %v2577_v23 }
  0x3e   :  { %2352 = vmatmul.mubr.msk.bf16.vlgmr.msra.gmra.mrb[0].mxu0 %vm129_vm0, %v411_v34  ;;  %2388 = vmatpush3.bf16.msra.mxu1 %v2577_v23  ;;  %v3024_v34 = vld [vmem:[%s3188_s2] ss:$0 sm:$0xff] }
  0x3f   :  { %2368 = vmatpush3.bf16.msra.mxu0 %v2765_v44  ;;  %2355 = vmatprep.mubr.msk.bf16.mxu0 %vm129_vm0, %v412_v36  ;;  %v2108_v44 = vld [vmem:[%s3184_s0 + $0x92] ss:$2 sm:$0xff] }
  0x40   :  { %v414_v50 = vpack.c.bf16 %v2108_v44, %v2107_v45  ;;  %2397 = vmatprep.subr.bf16.mxu1 %v3006_v24 }
  0x46   :  { %2356 = vmatmul.mubr.msk.bf16.gmra.mrb[4].mxu0 %vm129_vm0, %v413_v48 }
  0x47   :  { %2359 = vmatprep.mubr.msk.bf16.mxu0 %vm129_vm0, %v414_v50 }
  0x4e   :  { %2360 = vmatmul.mubr.msk.bf16.gmra.mrb[8].mxu0 %vm129_vm0, %v415_v1 }
  0x4f   :  { %2363 = vmatprep.mubr.msk.bf16.mxu0 %vm129_vm0, %v416_v57 }
  0x56   :  { %2364 = vmatmul.mubr.msk.bf16.gmra.mrb[12].mxu0 %vm129_vm0, %v417_v62 }
  0x57   :  { %2369 = vmatprep.mubr.msk.bf16.mxu0 %vm129_vm0, %v596_v63 }
  0x5e   :  { %2370 = vmatmul.mubr.msk.bf16.vlgmr.msra.gmra.mrb[0].mxu0 %vm129_vm0, %v597_v5 }
  0x5f   :  { %2373 = vmatprep.mubr.msk.bf16.mxu0 %vm129_vm0, %v598_v6 }
  0x66   :  { %2374 = vmatmul.mubr.msk.bf16.gmra.mrb[4].mxu0 %vm129_vm0, %v599_v11 }
  0x67   :  { %2377 = vmatprep.mubr.msk.bf16.mxu0 %vm129_vm0, %v600_v12 }
  0x6e   :  { %2378 = vmatmul.mubr.msk.bf16.gmra.mrb[8].mxu0 %vm129_vm0, %v601_v17 }
  0x6f   :  { %2381 = vmatprep.mubr.msk.bf16.mxu0 %vm129_vm0, %v602_v18 }
  0x76   :  { %2382 = vmatmul.mubr.msk.bf16.gmra.mrb[12].mxu0 %vm129_vm0, %v603_v21 }
  0x8c   :  { %v871_v30 = vpop.permute.xlu0 %870  ;;  %v877_v31 = vpop.permute.xlu1 %876 }
  0x8d   :  { %vm919_vm0 = vcmp.eq.s32.totalorder %v877_v31, 1  ;;  %vm917_vm12 = vcmp.eq.s32.totalorder %v871_v30, 1 }
  0x90   :  { %v874_v32 = vpop.permute.xlu0 %873  ;;  %v880_v33 = vpop.permute.xlu1 %879 }
  0x91   :  { %vm920_vm14 = vcmp.eq.s32.totalorder %v880_v33, 1  ;;  %vm918_vm2 = vcmp.eq.s32.totalorder %v874_v32, 1 }
  0x94   :  { %v883_v35 = vpop.permute.xlu0 %882  ;;  %v3027_v39 = vpop.permute.xlu1 %885 }
  0x95   :  { %vm921_vm4 = vcmp.eq.s32.totalorder %v883_v35, 1 }
  0x98   :  { %v889_v49 = vpop.permute.xlu0 %888  ;;  %v892_v55 = vpop.permute.xlu1 %891 }
  0x99   :  { %vm923_vm6 = vcmp.eq.s32.totalorder %v889_v49, 1  ;;  %vm924_vm9 = vcmp.eq.s32.totalorder %v892_v55, 1 }
  0x9c   :  { %v895_v3 = vpop.permute.xlu0 %894  ;;  %v898_v8 = vpop.permute.xlu1 %897 }
  0xa0   :  { %v901_v22 = vpop.permute.xlu0 %900 }
  0xdf   :  { %v3013_v26 = vpop.f32.mrb[0].mxu1 }
  0xe0   :  { %v3015_v27 = vpop.f32.mrb[1].mxu1 }
  0xe1   :  { %v3017_v28 = vpop.f32.mrb[2].mxu1 }
  0xe2   :  { %v3019_v29 = vpop.f32.mrb[3].mxu1 }
 0x131   :  { %v2371_v36 = vpop.f32.mrb[0].mxu0 }
 0x132   :  { %v759_v37 = vadd.f32 %v2371_v36, %v3024_v34  ;;  %v671_v38 = vpop.f32.mrb[1].mxu0  ;;  %v904_v36 = vpop.permute.xlu1 %903 }
 0x133   :  { %v757_v40 = vadd.f32 %v3024_v34, %v671_v38  ;;  %v2372_v41 = vpop.f32.mrb[2].mxu0 }
 0x134   :  { %vm775_vm11 = vcmp.ge.f32.partialorder %v759_v37, 0.0  ;;  %v791_v42 = vmul.f32 0.01, %v759_v37  ;;  %v760_v43 = vadd.f32 %v2372_v41, %v3024_v34  ;;  %v674_v45 = vpop.f32.mrb[3].mxu0 }
 0x135   :  { %vm773_vm13 = vcmp.ge.f32.partialorder %v757_v40, 0.0  ;;  %v789_v44 = vmul.f32 0.01, %v757_v40  ;;  %v758_v46 = vadd.f32 %v3024_v34, %v674_v45 }
 0x136   :  { %v807_v47 = vsel %vm775_vm11, %v759_v37, %v791_v42  ;;  %vm776_vm15 = vcmp.ge.f32.partialorder %v760_v43, 0.0  ;;  %v792_v48 = vmul.f32 0.01, %v760_v43  ;;  %v910_v55 = vpop.permute.xlu1 %909 }
 0x137   :  { %v935_v50 = vsel %vm919_vm0, %v807_v47, 0.0  ;;  %v805_v51 = vsel %vm773_vm13, %v757_v40, %v789_v44  ;;  %vm774_vm1 = vcmp.ge.f32.partialorder %v758_v46, 0.0  ;;  %v790_v52 = vmul.f32 0.01, %v758_v46 }
 0x138   :  { %952 = vst.msk [vmem:[#allocation2 + $0x10] sm:$0xff] %vm949_vm10, %v935_v50  ;;  %v933_v53 = vsel %vm917_vm12, %v805_v51, 0.0  ;;  %v808_v54 = vsel %vm776_vm15, %v760_v43, %v792_v48  ;;  %vm922_vm0 = vcmp.eq.s32.totalorder %v3027_v39, 1  ;;  %vm925_vm12 = vcmp.eq.s32.totalorder %v895_v3, 1 }
 0x139   :  { %950 = vst.msk [vmem:[#allocation2] sm:$0xff] %vm949_vm10, %v933_v53  ;;  %v936_v56 = vsel %vm920_vm14, %v808_v54, 0.0  ;;  %v806_v1 = vsel %vm774_vm1, %v758_v46, %v790_v52  ;;  %v2375_v57 = vpop.f32.mrb[4].mxu0  ;;  %vm927_vm14 = vcmp.eq.s32.totalorder %v901_v22, 1  ;;  %v907_v46 = vpop.permute.xlu0 %906 }
 0x13a   :  { %953 = vst.msk [vmem:[#allocation2 + $0x18] sm:$0xff] %vm949_vm10, %v936_v56  ;;  %v934_v58 = vsel %vm918_vm2, %v806_v1, 0.0  ;;  %v763_v59 = vadd.f32 %v2375_v57, %v3024_v34  ;;  %v687_v60 = vpop.f32.mrb[5].mxu0  ;;  %vm928_vm2 = vcmp.eq.s32.totalorder %v904_v36, 1 }
 0x13b   :  { %951 = vst.msk [vmem:[#allocation2 + $0x8] sm:$0xff] %vm949_vm10, %v934_v58  ;;  %v761_v61 = vadd.f32 %v3024_v34, %v687_v60  ;;  %v2376_v62 = vpop.f32.mrb[6].mxu0  ;;  %v2579_v58 = vld [vmem:[%s3187_s4 + $0x8] sm:$0xff]  }
 0x13c   :  { %vm779_vm3 = vcmp.ge.f32.partialorder %v763_v59, 0.0  ;;  %v795_v63 = vmul.f32 0.01, %v763_v59  ;;  %v764_v0 = vadd.f32 %v2376_v62, %v3024_v34  ;;  %v690_v2 = vpop.f32.mrb[7].mxu0 }
 0x13d   :  { %vm777_vm5 = vcmp.ge.f32.partialorder %v761_v61, 0.0  ;;  %v793_v4 = vmul.f32 0.01, %v761_v61  ;;  %v762_v5 = vadd.f32 %v3024_v34, %v690_v2 }
 0x13e   :  { %v811_v6 = vsel %vm779_vm3, %v763_v59, %v795_v63  ;;  %vm780_vm7 = vcmp.ge.f32.partialorder %v764_v0, 0.0  ;;  %v796_v7 = vmul.f32 0.01, %v764_v0  ;;  %vm926_vm3 = vcmp.eq.s32.totalorder %v898_v8, 1 }
 0x13f   :  { %v939_v9 = vsel %vm923_vm6, %v811_v6, 0.0  ;;  %v809_v10 = vsel %vm777_vm5, %v761_v61, %v793_v4  ;;  %vm778_vm8 = vcmp.ge.f32.partialorder %v762_v5, 0.0  ;;  %v794_v11 = vmul.f32 0.01, %v762_v5 }
 0x140   :  { %956 = vst.msk [vmem:[#allocation2 + $0x30] sm:$0xff] %vm949_vm10, %v939_v9  ;;  %v937_v12 = vsel %vm921_vm4, %v809_v10, 0.0  ;;  %v812_v13 = vsel %vm780_vm7, %v764_v0, %v796_v7  ;;  %vm929_vm5 = vcmp.eq.s32.totalorder %v907_v46, 1  ;;  %v913_v0 = vpop.permute.xlu0 %912 }
 0x141   :  { %954 = vst.msk [vmem:[#allocation2 + $0x20] sm:$0xff] %vm949_vm10, %v937_v12  ;;  %v940_v14 = vsel %vm924_vm9, %v812_v13, 0.0  ;;  %v810_v15 = vsel %vm778_vm8, %v762_v5, %v794_v11  ;;  %v2379_v16 = vpop.f32.mrb[8].mxu0  ;;  %v993_v17 = vld [vmem:[#allocation2 + $0x11] ss:$2 sm:$0xff]  ;;  %vm931_vm7 = vcmp.eq.s32.totalorder %v913_v0, 1  ;;  %v916_v5 = vpop.permute.xlu1 %915 }
 0x142   :  { %957 = vst.msk [vmem:[#allocation2 + $0x38] sm:$0xff] %vm949_vm10, %v940_v14  ;;  %v938_v18 = vsel %vm922_vm0, %v810_v15, 0.0  ;;  %v767_v19 = vadd.f32 %v2379_v16, %v3024_v34  ;;  %v703_v20 = vpop.f32.mrb[9].mxu0  ;;  %v991_v21 = vld [vmem:[#allocation2 + $0x1] ss:$2 sm:$0xff]  ;;  %vm932_vm0 = vcmp.eq.s32.totalorder %v916_v5, 1 }
 0x143   :  { %955 = vst.msk [vmem:[#allocation2 + $0x28] sm:$0xff] %vm949_vm10, %v938_v18  ;;  %v765_v23 = vadd.f32 %v3024_v34, %v703_v20  ;;  %v2380_v30 = vpop.f32.mrb[10].mxu0  ;;  %v1006_v31 = vpack.c.bf16 %v993_v17, %v991_v21  ;;  %v967_v16 = vld [vmem:[#allocation2] ss:$2 sm:$0xff]  ;;  %v969_v17 = vld [vmem:[#allocation2 + $0x10] ss:$2 sm:$0xff] }
 0x144   :  { %vm783_vm11 = vcmp.ge.f32.partialorder %v767_v19, 0.0  ;;  %v799_v32 = vmul.f32 0.01, %v767_v19  ;;  %v768_v33 = vadd.f32 %v2380_v30, %v3024_v34  ;;  %v706_v35 = vpop.f32.mrb[11].mxu0  ;;  %v982_v20 = vpack.c.bf16 %v969_v17, %v967_v16  ;;  %v1502_v0 = vpop.permute.xlu0 %1501 }
 0x145   :  { %vm781_vm13 = vcmp.ge.f32.partialorder %v765_v23, 0.0  ;;  %v797_v37 = vmul.f32 0.01, %v765_v23  ;;  %v766_v38 = vadd.f32 %v3024_v34, %v706_v35  ;;  %2389 = vmatprep.mubr.msk.bf16.mxu1 %vm949_vm10, %v1006_v31  ;;  %v2582_v35 = vld [vmem:[%s3187_s4 + $0x30] sm:$0xff]  }
 0x146   :  { %v815_v39 = vsel %vm783_vm11, %v767_v19, %v799_v32  ;;  %vm784_vm15 = vcmp.ge.f32.partialorder %v768_v33, 0.0  ;;  %v800_v40 = vmul.f32 0.01, %v768_v33  ;;  %vm930_vm11 = vcmp.eq.s32.totalorder %v910_v55, 1  ;;  %v2581_v32 = vld [vmem:[%s3187_s4 + $0x28] sm:$0xff]  }
 0x147   :  { %v943_v41 = vsel %vm927_vm14, %v815_v39, 0.0  ;;  %v813_v42 = vsel %vm781_vm13, %v765_v23, %v797_v37  ;;  %vm782_vm1 = vcmp.ge.f32.partialorder %v766_v38, 0.0  ;;  %v798_v43 = vmul.f32 0.01, %v766_v38 }
 0x148   :  { %960 = vst.msk [vmem:[#allocation2 + $0x50] sm:$0xff] %vm949_vm10, %v943_v41  ;;  %v941_v45 = vsel %vm925_vm12, %v813_v42, 0.0  ;;  %v816_v44 = vsel %vm784_vm15, %v768_v33, %v800_v40  ;;  %v1194_v40 = vld [vmem:[#allocation2 + $0x2] ss:$2 sm:$0xff]  ;;  %vm1524_vm13 = vcmp.eq.s32.totalorder %v1502_v0, 1 }
 0x149   :  { %958 = vst.msk [vmem:[#allocation2 + $0x40] sm:$0xff] %vm949_vm10, %v941_v45  ;;  %v944_v47 = vsel %vm928_vm2, %v816_v44, 0.0  ;;  %v814_v48 = vsel %vm782_vm1, %v766_v38, %v798_v43  ;;  %v2383_v49 = vpop.f32.mrb[12].mxu0  ;;  %v997_v50 = vld [vmem:[#allocation2 + $0x31] ss:$2 sm:$0xff] }
 0x14a   :  { %961 = vst.msk [vmem:[#allocation2 + $0x58] sm:$0xff] %vm949_vm10, %v944_v47  ;;  %v942_v51 = vsel %vm926_vm3, %v814_v48, 0.0  ;;  %v2483_v52 = vadd.f32 %v2383_v49, %v3013_v26  ;;  %v719_v53 = vpop.f32.mrb[13].mxu0  ;;  %v995_v54 = vld [vmem:[#allocation2 + $0x21] ss:$2 sm:$0xff]  ;;  %v2583_v47 = vld [vmem:[%s3187_s4 + $0x38] sm:$0xff]  }
 0x14b   :  { %959 = vst.msk [vmem:[#allocation2 + $0x48] sm:$0xff] %vm949_vm10, %v942_v51  ;;  %v2484_v56 = vadd.f32 %v719_v53, %v3015_v27  ;;  %v2384_v1 = vpop.f32.mrb[14].mxu0  ;;  %v1007_v57 = vpack.c.bf16 %v997_v50, %v995_v54  ;;  %v971_v21 = vld [vmem:[#allocation2 + $0x20] ss:$2 sm:$0xff]  ;;  %v973_v22 = vld [vmem:[#allocation2 + $0x30] ss:$2 sm:$0xff] }
 0x14c   :  { %v771_v59 = vadd.f32 %v2483_v52, %v3024_v34  ;;  %v2485_v60 = vadd.f32 %v2384_v1, %v3017_v28  ;;  %v722_v61 = vpop.f32.mrb[15].mxu0  ;;  %v2580_v28 = vld [vmem:[%s3187_s4 + $0x20] sm:$0xff]   ;;  %v983_v31 = vpack.c.bf16 %v973_v22, %v971_v21 }
 0x14d   :  { %v769_v26 = vadd.f32 %v2484_v56, %v3024_v34  ;;  %v2486_v62 = vadd.f32 %v722_v61, %v3019_v29  ;;  %2390 = vmatmul.mubr.msk.bf16.vlgmr.msra.gmra.mrb[4].mxu1 %vm949_vm10, %v1007_v57  ;;  %v1196_v38 = vld [vmem:[#allocation2 + $0x12] ss:$2 sm:$0xff]  ;;  %v1198_v45 = vld [vmem:[#allocation2 + $0x22] ss:$2 sm:$0xff]  ;;  %v1318_v51 = vld [vmem:[#allocation2 + $0x13] ss:$2 sm:$0xff] }
 0x14e   :  { %vm787_vm4 = vcmp.ge.f32.partialorder %v771_v59, 0.0  ;;  %v803_v63 = vmul.f32 0.01, %v771_v59  ;;  %v772_v27 = vadd.f32 %v2485_v60, %v3024_v34  ;;  %2398 = vmatpush3.bf16.msra.mxu1 %v3006_v24  ;;  %v1209_v41 = vpack.c.bf16 %v1196_v38, %v1194_v40  ;;  %v1316_v53 = vld [vmem:[#allocation2 + $0x3] ss:$2 sm:$0xff] }
 0x14f   :  { %vm785_vm6 = vcmp.ge.f32.partialorder %v769_v26, 0.0  ;;  %v801_v2 = vmul.f32 0.01, %v769_v26  ;;  %v770_v3 = vadd.f32 %v2486_v62, %v3024_v34  ;;  %2399 = vmatprep.subr.bf16.mxu1 %v2579_v58  ;;  %v1331_v54 = vpack.c.bf16 %v1318_v51, %v1316_v53  ;;  %v1320_v1 = vld [vmem:[#allocation2 + $0x23] ss:$2 sm:$0xff] }
 0x150   :  { %v819_v29 = vsel %vm787_vm4, %v771_v59, %v803_v63  ;;  %vm788_vm8 = vcmp.ge.f32.partialorder %v772_v27, 0.0  ;;  %v804_v4 = vmul.f32 0.01, %v772_v27  ;;  %v1200_v42 = vld [vmem:[#allocation2 + $0x32] ss:$2 sm:$0xff] }
 0x151   :  { %v947_v6 = vsel %vm931_vm7, %v819_v29, 0.0  ;;  %v817_v7 = vsel %vm785_vm6, %v769_v26, %v801_v2  ;;  %vm786_vm9 = vcmp.ge.f32.partialorder %v770_v3, 0.0  ;;  %v802_v24 = vmul.f32 0.01, %v770_v3  ;;  %v1001_v8 = vld [vmem:[#allocation2 + $0x51] ss:$2 sm:$0xff]  ;;  %v1505_v2 = vpop.permute.xlu1 %1504 }
 0x152   :  { %964 = vst.msk [vmem:[#allocation2 + $0x70] sm:$0xff] %vm949_vm10, %v947_v6  ;;  %v945_v34 = vsel %vm929_vm5, %v817_v7, 0.0  ;;  %v820_v9 = vsel %vm788_vm8, %v772_v27, %v804_v4  ;;  %v999_v10 = vld [vmem:[#allocation2 + $0x41] ss:$2 sm:$0xff]  ;;  %2400 = vmatpush3.bf16.msra.mxu1 %v2579_v58  ;;  %v975_v23 = vld [vmem:[#allocation2 + $0x40] ss:$2 sm:$0xff]  ;;  %v1210_v44 = vpack.c.bf16 %v1200_v42, %v1198_v45 }
 0x153   :  { %962 = vst.msk [vmem:[#allocation2 + $0x60] sm:$0xff] %vm949_vm10, %v945_v34  ;;  %v948_v11 = vsel %vm932_vm0, %v820_v9, 0.0  ;;  %v818_v12 = vsel %vm786_vm9, %v770_v3, %v802_v24  ;;  %v1008_v13 = vpack.c.bf16 %v1001_v8, %v999_v10  ;;  %2409 = vmatprep.subr.bf16.mxu1 %v2580_v28  ;;  %v977_v30 = vld [vmem:[#allocation2 + $0x50] ss:$2 sm:$0xff]  ;;  %v1322_v55 = vld [vmem:[#allocation2 + $0x33] ss:$2 sm:$0xff]  ;;  %v1508_v3 = vpop.permute.xlu0 %1507 }
 0x154   :  { %965 = vst.msk [vmem:[#allocation2 + $0x78] sm:$0xff] %vm949_vm10, %v948_v11  ;;  %v946_v14 = vsel %vm930_vm11, %v818_v12, 0.0  ;;  %v984_v33 = vpack.c.bf16 %v977_v30, %v975_v23  ;;  %v1202_v46 = vld [vmem:[#allocation2 + $0x42] ss:$2 sm:$0xff]  ;;  %v1332_v57 = vpack.c.bf16 %v1322_v55, %v1320_v1  ;;  %v1324_v58 = vld [vmem:[#allocation2 + $0x43] ss:$2 sm:$0xff] }
 0x155   :  { %963 = vst.msk [vmem:[#allocation2 + $0x68] sm:$0xff] %vm949_vm10, %v946_v14  ;;  %2393 = vmatprep.mubr.msk.bf16.mxu1 %vm949_vm10, %v1008_v13  ;;  %v2584_v62 = vld [vmem:[%s3189_s7 + $0x10] sm:$0xff]   ;;  %v2585_v63 = vld [vmem:[%s3189_s7 + $0x18] sm:$0xff]   ;;  %v3109_v27 = vld [vmem:[%s3189_s7] sm:$0xff]   ;;  %v1511_v29 = vpop.permute.xlu1 %1510  ;;  %vm1526_vm15 = vcmp.eq.s32.totalorder %v1508_v3, 1  ;;  %vm1525_vm4 = vcmp.eq.s32.totalorder %v1505_v2, 1 }
 0x156   :  { %vm1527_vm3 = vcmp.eq.s32.totalorder %v1511_v29, 1 }
 0x157   :  { %v1514_v10 = vpop.permute.xlu0 %1513 }
 0x158   :  { %vm1528_vm6 = vcmp.eq.s32.totalorder %v1514_v10, 1 }
 0x15a   :  { %v1204_v43 = vld [vmem:[#allocation2 + $0x52] ss:$2 sm:$0xff]  ;;  %v1326_v56 = vld [vmem:[#allocation2 + $0x53] ss:$2 sm:$0xff] }
 0x15b   :  { %v1005_v15 = vld [vmem:[#allocation2 + $0x71] ss:$2 sm:$0xff]  ;;  %v981_v37 = vld [vmem:[#allocation2 + $0x70] ss:$2 sm:$0xff]  ;;  %v1211_v48 = vpack.c.bf16 %v1204_v43, %v1202_v46  ;;  %v1333_v59 = vpack.c.bf16 %v1326_v56, %v1324_v58 }
 0x15c   :  { %v1003_v18 = vld [vmem:[#allocation2 + $0x61] ss:$2 sm:$0xff]  ;;  %v979_v36 = vld [vmem:[#allocation2 + $0x60] ss:$2 sm:$0xff] }
 0x15d   :  { %v1009_v19 = vpack.c.bf16 %v1005_v15, %v1003_v18  ;;  %v985_v39 = vpack.c.bf16 %v981_v37, %v979_v36  ;;  %v1206_v49 = vld [vmem:[#allocation2 + $0x62] ss:$2 sm:$0xff]  ;;  %v1208_v50 = vld [vmem:[#allocation2 + $0x72] ss:$2 sm:$0xff]  ;;  %v1328_v60 = vld [vmem:[#allocation2 + $0x63] ss:$2 sm:$0xff]  ;;  %v1517_v15 = vpop.permute.xlu1 %1516 }
 0x15e   :  { %v1212_v52 = vpack.c.bf16 %v1208_v50, %v1206_v49  ;;  %v1330_v61 = vld [vmem:[#allocation2 + $0x73] ss:$2 sm:$0xff] }
 0x15f   :  { %2394 = vmatmul.mubr.msk.bf16.gmra.mrb[8].mxu1 %vm949_vm10, %v1009_v19  ;;  %v1334_v26 = vpack.c.bf16 %v1330_v61, %v1328_v60  ;;  %v2587_v60 = vld [vmem:[%s3189_s7 + $0x8] sm:$0xff]  }
 0x160   :  { %2401 = vmatprep.mubr.msk.bf16.mxu1 %vm949_vm10, %v982_v20 }
 0x161   :  { %v1523_v40 = vpop.permute.xlu1 %1522 }
 0x162   :  { %vm1531_vm11 = vcmp.eq.s32.totalorder %v1523_v40, 1 }
 0x167   :  { %2402 = vmatmul.mubr.msk.bf16.vlgmr.msra.gmra.mrb[4].mxu1 %vm949_vm10, %v983_v31 }
 0x168   :  { %2405 = vmatprep.mubr.msk.bf16.mxu1 %vm949_vm10, %v984_v33  ;;  %2410 = vmatpush3.bf16.msra.mxu1 %v2580_v28  ;;  %v2190_v28 = vld [vmem:[%s3190_s5] ss:$0 sm:$0xff]  ;;  %v1520_v33 = vpop.permute.xlu0 %1519 }
 0x169   :  { %2411 = vmatprep.subr.bf16.mxu1 %v2581_v32  ;;  %vm1530_vm8 = vcmp.eq.s32.totalorder %v1520_v33, 1 }
 0x16c   :  { %2412 = vmatpush3.bf16.msra.mxu1 %v2581_v32 }
 0x16d   :  { %2421 = vmatprep.subr.bf16.mxu1 %v2582_v35 }
 0x16f   :  { %2406 = vmatmul.mubr.msk.bf16.gmra.mrb[8].mxu1 %vm949_vm10, %v985_v39 }
 0x170   :  { %2413 = vmatprep.mubr.msk.bf16.mxu1 %vm949_vm10, %v1209_v41 }
 0x177   :  { %2414 = vmatmul.mubr.msk.bf16.vlgmr.msra.gmra.mrb[4].mxu1 %vm949_vm10, %v1210_v44 }
 0x178   :  { %2417 = vmatprep.mubr.msk.bf16.mxu1 %vm949_vm10, %v1211_v48  ;;  %2422 = vmatpush3.bf16.msra.mxu1 %v2582_v35 }
 0x179   :  { %2423 = vmatprep.subr.bf16.mxu1 %v2583_v47 }
 0x17c   :  { %2424 = vmatpush3.bf16.msra.mxu1 %v2583_v47 }
 0x17d   :  { %2433 = vmatprep.subr.bf16.mxu1 %v2584_v62 }
 0x17f   :  { %2418 = vmatmul.mubr.msk.bf16.gmra.mrb[8].mxu1 %vm949_vm10, %v1212_v52 }
 0x180   :  { %2425 = vmatprep.mubr.msk.bf16.mxu1 %vm949_vm10, %v1331_v54 }
 0x187   :  { %2426 = vmatmul.mubr.msk.bf16.vlgmr.msra.gmra.mrb[4].mxu1 %vm949_vm10, %v1332_v57 }
 0x188   :  { %2429 = vmatprep.mubr.msk.bf16.mxu1 %vm949_vm10, %v1333_v59  ;;  %2434 = vmatpush3.bf16.msra.mxu1 %v2584_v62 }
 0x189   :  { %2435 = vmatprep.subr.bf16.mxu1 %v2585_v63 }
 0x18c   :  { %2436 = vmatpush3.bf16.msra.mxu1 %v2585_v63 }
 0x18d   :  { %2441 = vmatprep.subr.bf16.mxu1 %v3109_v27 }
 0x18f   :  { %2430 = vmatmul.mubr.msk.bf16.gmra.mrb[8].mxu1 %vm949_vm10, %v1334_v26  ;;  %v2588_v26 = vld [vmem:[%s3189_s7 + $0x20] sm:$0xff]  }
 0x25a   :  { %v2427_v4 = vpop.f32.mrb[4].mxu1 }
 0x25b   :  { %v1446_v5 = vadd.f32 %v2427_v4, %v2190_v28  ;;  %v1398_v6 = vpop.f32.mrb[5].mxu1 }
 0x25c   :  { %v1444_v7 = vadd.f32 %v2190_v28, %v1398_v6  ;;  %v2428_v24 = vpop.f32.mrb[6].mxu1 }
 0x25d   :  { %vm1454_vm12 = vcmp.ge.f32.partialorder %v1446_v5, 0.0  ;;  %v1462_v8 = vmul.f32 0.01, %v1446_v5  ;;  %v1447_v34 = vadd.f32 %v2428_v24, %v2190_v28  ;;  %v1401_v9 = vpop.f32.mrb[7].mxu1 }
 0x25e   :  { %vm1452_vm14 = vcmp.ge.f32.partialorder %v1444_v7, 0.0  ;;  %v1460_v11 = vmul.f32 0.01, %v1444_v7  ;;  %v1445_v12 = vadd.f32 %v2190_v28, %v1401_v9 }
 0x25f   :  { %v1470_v13 = vsel %vm1454_vm12, %v1446_v5, %v1462_v8  ;;  %vm1455_vm1 = vcmp.ge.f32.partialorder %v1447_v34, 0.0  ;;  %v1463_v14 = vmul.f32 0.01, %v1447_v34  ;;  %vm1529_vm12 = vcmp.eq.s32.totalorder %v1517_v15, 1  ;;  %v2591_v8 = vld [vmem:[%s3189_s7 + $0x38] sm:$0xff]  }
 0x260   :  { %v1534_v16 = vsel %vm1526_vm15, %v1470_v13, 0.0  ;;  %v1468_v17 = vsel %vm1452_vm14, %v1444_v7, %v1460_v11  ;;  %vm1453_vm2 = vcmp.ge.f32.partialorder %v1445_v12, 0.0  ;;  %v1461_v18 = vmul.f32 0.01, %v1445_v12  ;;  %v2593_v13 = vld [vmem:[%s3191_s9 + $0x18] sm:$0xff]  }
 0x261   :  { %1542 = vst.msk [vmem:[#allocation3 + $0x10] sm:$0xff] %vm949_vm10, %v1534_v16  ;;  %v1532_v19 = vsel %vm1524_vm13, %v1468_v17, 0.0  ;;  %v1471_v20 = vsel %vm1455_vm1, %v1447_v34, %v1463_v14  ;;  %vm2598_vm13 = vmmov 0   ;;  %v2219_v14 = vld [vmem:[%s3192_s8] ss:$0 sm:$0xff] }
 0x262   :  { %1540 = vst.msk [vmem:[#allocation3] sm:$0xff] %vm949_vm10, %v1532_v19  ;;  %v1535_v21 = vsel %vm1527_vm3, %v1471_v20, 0.0  ;;  %v1469_v22 = vsel %vm1453_vm2, %v1445_v12, %v1461_v18  ;;  %v2431_v23 = vpop.f32.mrb[8].mxu1  ;;  %v2592_v12 = vld [vmem:[%s3191_s9 + $0x10] sm:$0xff]   ;;  %vm2042_vm3 = vcmask 80896  }
 0x263   :  { %1543 = vst.msk [vmem:[#allocation3 + $0x18] sm:$0xff] %vm949_vm10, %v1535_v21  ;;  %v1533_v30 = vsel %vm1525_vm4, %v1469_v22, 0.0  ;;  %v1450_v31 = vadd.f32 %v2431_v23, %v2190_v28  ;;  %v1414_v32 = vpop.f32.mrb[9].mxu1 }
 0x264   :  { %1541 = vst.msk [vmem:[#allocation3 + $0x8] sm:$0xff] %vm949_vm10, %v1533_v30  ;;  %v1448_v35 = vadd.f32 %v2190_v28, %v1414_v32  ;;  %v2432_v36 = vpop.f32.mrb[10].mxu1 }
 0x265   :  { %vm1458_vm5 = vcmp.ge.f32.partialorder %v1450_v31, 0.0  ;;  %v1466_v37 = vmul.f32 0.01, %v1450_v31  ;;  %v1451_v38 = vadd.f32 %v2432_v36, %v2190_v28  ;;  %v1417_v39 = vpop.f32.mrb[11].mxu1 }
 0x266   :  { %vm1456_vm7 = vcmp.ge.f32.partialorder %v1448_v35, 0.0  ;;  %v1464_v41 = vmul.f32 0.01, %v1448_v35  ;;  %v1449_v42 = vadd.f32 %v2190_v28, %v1417_v39  ;;  %v2589_v28 = vld [vmem:[%s3189_s7 + $0x28] sm:$0xff]   ;;  %v2594_v39 = vld [vmem:[%s3191_s9] sm:$0xff]  }
 0x267   :  { %v1474_v43 = vsel %vm1458_vm5, %v1450_v31, %v1466_v37  ;;  %vm1459_vm9 = vcmp.ge.f32.partialorder %v1451_v38, 0.0  ;;  %v1467_v45 = vmul.f32 0.01, %v1451_v38 }
 0x268   :  { %v1538_v44 = vsel %vm1530_vm8, %v1474_v43, 0.0  ;;  %v1472_v46 = vsel %vm1456_vm7, %v1448_v35, %v1464_v41  ;;  %vm1457_vm0 = vcmp.ge.f32.partialorder %v1449_v42, 0.0  ;;  %v1465_v47 = vmul.f32 0.01, %v1449_v42  ;;  %v2595_v41 = vld [vmem:[%s3191_s9 + $0x8] sm:$0xff]  }
 0x269   :  { %1546 = vst.msk [vmem:[#allocation3 + $0x30] sm:$0xff] %vm949_vm10, %v1538_v44  ;;  %v1536_v48 = vsel %vm1528_vm6, %v1472_v46, 0.0  ;;  %v1475_v49 = vsel %vm1459_vm9, %v1451_v38, %v1467_v45 }
 0x26a   :  { %1544 = vst.msk [vmem:[#allocation3 + $0x20] sm:$0xff] %vm949_vm10, %v1536_v48  ;;  %v1539_v50 = vsel %vm1531_vm11, %v1475_v49, 0.0  ;;  %v1473_v51 = vsel %vm1457_vm0, %v1449_v42, %v1465_v47  ;;  %v1565_v52 = vld [vmem:[#allocation3 + $0x11] ss:$2 sm:$0xff]  ;;  %v1551_v57 = vld [vmem:[#allocation3 + $0x10] ss:$2 sm:$0xff] }
 0x26b   :  { %1547 = vst.msk [vmem:[#allocation3 + $0x38] sm:$0xff] %vm949_vm10, %v1539_v50  ;;  %v1537_v53 = vsel %vm1529_vm12, %v1473_v51, 0.0  ;;  %v1563_v54 = vld [vmem:[#allocation3 + $0x1] ss:$2 sm:$0xff]  ;;  %v1549_v1 = vld [vmem:[#allocation3] ss:$2 sm:$0xff] }
 0x26c   :  { %1545 = vst.msk [vmem:[#allocation3 + $0x28] sm:$0xff] %vm949_vm10, %v1537_v53  ;;  %v1570_v55 = vpack.c.bf16 %v1565_v52, %v1563_v54  ;;  %v1556_v61 = vpack.c.bf16 %v1551_v57, %v1549_v1  ;;  %v1712_v3 = vld [vmem:[#allocation3 + $0x2] ss:$2 sm:$0xff]  ;;  %v1798_v24 = vld [vmem:[#allocation3 + $0x3] ss:$2 sm:$0xff] }
 0x26d   :  { %v2230_v49 = vld [vmem:[%s3193_s10] ss:$0 sm:$0xff] }
 0x26e   :  { %2437 = vmatprep.mubr.msk.bf16.mxu1 %vm949_vm10, %v1570_v55 }
 0x271   :  { %v1714_v0 = vld [vmem:[#allocation3 + $0x12] ss:$2 sm:$0xff]  ;;  %v1800_v6 = vld [vmem:[#allocation3 + $0x13] ss:$2 sm:$0xff] }
 0x272   :  { %v1569_v56 = vld [vmem:[#allocation3 + $0x31] ss:$2 sm:$0xff]  ;;  %v1555_v63 = vld [vmem:[#allocation3 + $0x30] ss:$2 sm:$0xff]  ;;  %v1719_v29 = vpack.c.bf16 %v1714_v0, %v1712_v3  ;;  %v1805_v34 = vpack.c.bf16 %v1800_v6, %v1798_v24 }
 0x273   :  { %v1567_v58 = vld [vmem:[#allocation3 + $0x21] ss:$2 sm:$0xff]  ;;  %v1553_v62 = vld [vmem:[#allocation3 + $0x20] ss:$2 sm:$0xff] }
 0x274   :  { %v1571_v59 = vpack.c.bf16 %v1569_v56, %v1567_v58  ;;  %v1557_v2 = vpack.c.bf16 %v1555_v63, %v1553_v62  ;;  %v1716_v4 = vld [vmem:[#allocation3 + $0x22] ss:$2 sm:$0xff]  ;;  %v1718_v5 = vld [vmem:[#allocation3 + $0x32] ss:$2 sm:$0xff]  ;;  %v1802_v9 = vld [vmem:[#allocation3 + $0x23] ss:$2 sm:$0xff] }
 0x275   :  { %v1720_v7 = vpack.c.bf16 %v1718_v5, %v1716_v4  ;;  %v1804_v10 = vld [vmem:[#allocation3 + $0x33] ss:$2 sm:$0xff] }
 0x276   :  { %2438 = vmatmul.mubr.msk.bf16.vlgmr.msra.gmra.mrb[12].mxu1 %vm949_vm10, %v1571_v59  ;;  %v1806_v11 = vpack.c.bf16 %v1804_v10, %v1802_v9 }
 0x277   :  { %2442 = vmatpush3.bf16.msra.mxu1 %v3109_v27  ;;  %2445 = vmatprep.mubr.msk.bf16.mxu1 %vm949_vm10, %v1556_v61  ;;  %v2590_v27 = vld [vmem:[%s3189_s7 + $0x30] sm:$0xff]  }
 0x278   :  { %2443 = vmatprep.subr.bf16.mxu1 %v2587_v60 }
 0x27b   :  { %2444 = vmatpush3.bf16.msra.mxu1 %v2587_v60 }
 0x27c   :  { %2449 = vmatprep.subr.bf16.mxu1 %v2588_v26 }
 0x282   :  { %2446 = vmatmul.mubr.msk.bf16.vlgmr.msra.gmra.mrb[12].mxu1 %vm949_vm10, %v1557_v2 }
 0x283   :  { %2450 = vmatpush3.bf16.msra.mxu1 %v2588_v26  ;;  %2453 = vmatprep.mubr.msk.bf16.mxu1 %vm949_vm10, %v1719_v29 }
 0x284   :  { %2451 = vmatprep.subr.bf16.mxu1 %v2589_v28 }
 0x287   :  { %2452 = vmatpush3.bf16.msra.mxu1 %v2589_v28 }
 0x288   :  { %2457 = vmatprep.subr.bf16.mxu1 %v2590_v27 }
 0x28e   :  { %2454 = vmatmul.mubr.msk.bf16.vlgmr.msra.gmra.mrb[12].mxu1 %vm949_vm10, %v1720_v7 }
 0x28f   :  { %2458 = vmatpush3.bf16.msra.mxu1 %v2590_v27  ;;  %2461 = vmatprep.mubr.msk.bf16.mxu1 %vm949_vm10, %v1805_v34 }
 0x290   :  { %2459 = vmatprep.subr.bf16.mxu1 %v2591_v8 }
 0x293   :  { %2460 = vmatpush3.bf16.msra.mxu1 %v2591_v8 }
 0x294   :  { %2465 = vmatprep.subr.bf16.mxu1 %v2597_v25 }
 0x29a   :  { %2462 = vmatmul.mubr.msk.bf16.vlgmr.msra.gmra.mrb[12].mxu1 %vm949_vm10, %v1806_v11 }
 0x29b   :  { %2469 = vmatprep.mubr.msk.bf16.mxu1 %vm2598_vm13, %v2597_v25  ;;  %2466 = vmatpush3.bf16.msra.mxu1 %v2592_v12 }
 0x29c   :  { %2467 = vmatprep.subr.bf16.mxu1 %v2597_v25 }
 0x29f   :  { %2468 = vmatpush3.bf16.msra.mxu1 %v2593_v13 }
 0x2a0   :  { %2473 = vmatprep.subr.bf16.mxu1 %v2597_v25 }
 0x36d   :  { %v2463_v15 = vpop.f32.mrb[12].mxu1 }
 0x36e   :  { %v1892_v16 = vadd.f32 %v2463_v15, %v2219_v14  ;;  %v1864_v17 = vpop.f32.mrb[13].mxu1 }
 0x36f   :  { %v1890_v18 = vadd.f32 %v2219_v14, %v1864_v17  ;;  %v2464_v19 = vpop.f32.mrb[14].mxu1 }
 0x370   :  { %vm1896_vm14 = vcmp.ge.f32.partialorder %v1892_v16, 0.0  ;;  %v1900_v20 = vmul.f32 0.01, %v1892_v16  ;;  %v1893_v21 = vadd.f32 %v2464_v19, %v2219_v14  ;;  %v1867_v22 = vpop.f32.mrb[15].mxu1 }
 0x371   :  { %vm1894_vm15 = vcmp.ge.f32.partialorder %v1890_v18, 0.0  ;;  %v1898_v23 = vmul.f32 0.01, %v1890_v18  ;;  %v1891_v30 = vadd.f32 %v2219_v14, %v1867_v22 }
 0x372   :  { %v1904_v31 = vsel %vm1896_vm14, %v1892_v16, %v1900_v20  ;;  %vm1897_vm1 = vcmp.ge.f32.partialorder %v1893_v21, 0.0  ;;  %v1901_v32 = vmul.f32 0.01, %v1893_v21 }
 0x373   :  { %1908 = vst.msk [vmem:[#allocation4 + $0x10] sm:$0xff] %vm949_vm10, %v1904_v31  ;;  %v1902_v33 = vsel %vm1894_vm15, %v1890_v18, %v1898_v23  ;;  %vm1895_vm2 = vcmp.ge.f32.partialorder %v1891_v30, 0.0  ;;  %v1899_v35 = vmul.f32 0.01, %v1891_v30 }
 0x374   :  { %1906 = vst.msk [vmem:[#allocation4] sm:$0xff] %vm949_vm10, %v1902_v33  ;;  %v1905_v36 = vsel %vm1897_vm1, %v1893_v21, %v1901_v32 }
 0x375   :  { %1909 = vst.msk [vmem:[#allocation4 + $0x18] sm:$0xff] %vm949_vm10, %v1905_v36  ;;  %v1903_v37 = vsel %vm1895_vm2, %v1891_v30, %v1899_v35 }
 0x376   :  { %1907 = vst.msk [vmem:[#allocation4 + $0x8] sm:$0xff] %vm949_vm10, %v1903_v37 }
 0x37d   :  { %v1917_v38 = vld [vmem:[#allocation4 + $0x1] ss:$4 sm:$0xff]  ;;  %v1910_v42 = vld [vmem:[#allocation4] ss:$4 sm:$0xff] }
 0x37e   :  { %v1918_v40 = vpack.c.bf16 %v1917_v38, %v1917_v38  ;;  %v1911_v43 = vpack.c.bf16 %v1910_v42, %v1910_v42 }
 0x380   :  { %2470 = vmatmul.mubr.msk.bf16.vlgmr.msra.gmra.mrb[16].mxu1 %vm949_vm10, %v1918_v40 }
 0x381   :  { %2474 = vmatpush3.bf16.msra.mxu1 %v2594_v39  ;;  %2477 = vmatprep.mubr.msk.bf16.mxu1 %vm2598_vm13, %v2597_v25 }
 0x382   :  { %2475 = vmatprep.subr.bf16.mxu1 %v2597_v25 }
 0x385   :  { %2476 = vmatpush3.bf16.msra.mxu1 %v2595_v41 }
 0x388   :  { %2478 = vmatmul.mubr.msk.bf16.vlgmr.msra.gmra.mrb[20].mxu1 %vm949_vm10, %v1911_v43 }
 0x453   :  { %v1973_v45 = vpop.f32.mrb[16].mxu1 }
 0x454   :  { %v2471_v44 = vpop.f32.mrb[17].mxu1 }
 0x455   :  { %v1976_v46 = vpop.f32.mrb[18].mxu1 }
 0x456   :  { %v2472_v47 = vpop.f32.mrb[19].mxu1 }
 0x45b   :  { %v2028_v48 = vpop.f32.mrb[20].mxu1 }
 0x45c   :  { %v2029_v50 = vadd.f32 %v2028_v48, %v1973_v45  ;;  %v2479_v51 = vpop.f32.mrb[21].mxu1 }
 0x45d   :  { %v2031_v52 = vpop.f32.mrb[22].mxu1 }
 0x45e   :  { %v2041_v53 = vadd.f32 %v2230_v49, %v2029_v50  ;;  %v2480_v25 = vpop.f32.mrb[23].mxu1 }
 0x460   :  { %2043 = vst.msk [vmem:[%s3194_s11] sm:$0xff] %vm2042_vm3, %v2041_v53 }

</bundles_post_ra>
